<compile_context>
chip_gen: v7x
topology: tpu7x:2x2x1
jax: 0.10.0
libtpu: 0.0.40
codegen_flags: <defaults>
</compile_context>

<pallas_src>
import functools
import math

import jax
import jax.numpy as jnp
from jax.experimental import pallas as pl
from jax.experimental.pallas import tpu as pltpu


# ---------------------------------------------------------------------------
# Fused MHA kernel: one batch-block per grid step, all heads together.
# ---------------------------------------------------------------------------
def _mha_fused_kernel(q_ref, k_ref, v_ref, m_ref,
                      wq_ref, bq_ref, wk_ref, bk_ref, wv_ref, bv_ref,
                      wo_ref, bo_ref, g_ref, beta_ref,
                      o_ref, *attn_refs,
                      n_head, d_k, d_v, inv_temp, eps):
    bt, len_q, d_model = q_ref.shape
    _, len_k, _ = k_ref.shape
    rows_q = bt * len_q
    rows_k = bt * len_k
    bf = jnp.bfloat16

    # Residual kept in f32; matmul operands cast to bf16 (f32 accumulation).
    x_q = q_ref[...].reshape(rows_q, d_model)
    x_k = k_ref[...].reshape(rows_k, d_model)
    x_v = v_ref[...].reshape(rows_k, d_model)

    # --- fused Q/K/V projections, M = block_b * len  (MXU, bf16 operands) ---
    q2 = jnp.dot(x_q.astype(bf), wq_ref[...], preferred_element_type=jnp.float32) + bq_ref[...]
    k2 = jnp.dot(x_k.astype(bf), wk_ref[...], preferred_element_type=jnp.float32) + bk_ref[...]
    v2 = jnp.dot(x_v.astype(bf), wv_ref[...], preferred_element_type=jnp.float32) + bv_ref[...]
    q2 = q2 * jnp.float32(inv_temp)        # fold 1/temperature into q (smaller than scores)

    # --- head split: one reshape + one transpose per tensor (no per-head lane slices) ---
    def split_heads(x, length, dim):
        x = x.reshape(bt, length, n_head, dim)
        x = jnp.transpose(x, (0, 2, 1, 3))               # (bt, H, len, dim)
        return x.reshape(bt * n_head, length, dim)

    qh = split_heads(q2, len_q, d_k).astype(bf)
    kh = split_heads(k2, len_k, d_k).astype(bf)
    vh = split_heads(v2, len_k, d_v).astype(bf)

    # --- scores for all (batch, head) pairs at once: (bt*H, Lq, Lk) ---
    s = jnp.einsum("zqd,zkd->zqk", qh, kh, preferred_element_type=jnp.float32)
    s = s.reshape(bt, n_head, len_q, len_k)

    # masked_fill via a single select; int8 mask shared across heads.
    # (-1e30 instead of -inf: avoids inf-inf NaN for fully-masked rows.)
    masked = (m_ref[...] != 0)[:, None, :, :]
    s = jnp.where(masked, jnp.float32(-1e30), s)

    # --- softmax over keys; EUP reciprocal instead of a VPU divide ---
    p = jnp.exp(s - jnp.max(s, axis=-1, keepdims=True))
    attn = p * pl.reciprocal(jnp.sum(p, axis=-1, keepdims=True), approx=True)

    if attn_refs:                                         # attention probs are optional
        # store head-major: (H, bt, Lq, Lk); attn dropout = identity (eval)
        attn_refs[0][...] = jnp.transpose(attn, (1, 0, 2, 3)).astype(attn_refs[0].dtype)

    # --- context, heads merged back to (rows_q, H*d_v) for the fc projection ---
    ctx = jnp.einsum("zqk,zkd->zqd",
                     attn.reshape(bt * n_head, len_q, len_k).astype(bf), vh,
                     preferred_element_type=jnp.float32)
    ctx = ctx.reshape(bt, n_head, len_q, d_v)
    ctx = jnp.transpose(ctx, (0, 2, 1, 3)).reshape(rows_q, n_head * d_v)

    # --- fc + dropout(identity, eval) + residual + one-pass LayerNorm, fused ---
    y = jnp.dot(ctx.astype(bf), wo_ref[...], preferred_element_type=jnp.float32) + bo_ref[...]
    y = y + x_q
    inv_d = jnp.float32(1.0 / d_model)
    mean = jnp.sum(y, axis=-1, keepdims=True) * inv_d
    ex2 = jnp.sum(y * y, axis=-1, keepdims=True) * inv_d
    var = ex2 - mean * mean
    o = (y - mean) * jax.lax.rsqrt(var + eps) * g_ref[...] + beta_ref[...]
    o_ref[...] = o.reshape(bt, len_q, d_model)


# ---------------------------------------------------------------------------
# One-time weight prep: transpose, reshape biases, cast weights to bf16.
# ---------------------------------------------------------------------------
def prepare_mha_params(params, weight_dtype=jnp.bfloat16):
    n_head, d_k, d_v = params["n_head"], params["d_k"], params["d_v"]
    d_model = params["w_qs_w"].shape[1]
    return {
        "n_head": n_head, "d_k": d_k, "d_v": d_v, "d_model": d_model,
        "wq_t": jnp.asarray(params["w_qs_w"]).T.astype(weight_dtype),      # (D, H*d_k)
        "bq": jnp.asarray(params["w_qs_b"], jnp.float32).reshape(1, n_head * d_k),
        "wk_t": jnp.asarray(params["w_ks_w"]).T.astype(weight_dtype),
        "bk": jnp.asarray(params["w_ks_b"], jnp.float32).reshape(1, n_head * d_k),
        "wv_t": jnp.asarray(params["w_vs_w"]).T.astype(weight_dtype),      # (D, H*d_v)
        "bv": jnp.asarray(params["w_vs_b"], jnp.float32).reshape(1, n_head * d_v),
        "wo_t": jnp.asarray(params["fc_w"]).T.astype(weight_dtype),        # (H*d_v, D)
        "bo": jnp.asarray(params["fc_b"], jnp.float32).reshape(1, d_model),
        "ln_g": jnp.asarray(params["ln_w"], jnp.float32).reshape(1, d_model),
        "ln_b": jnp.asarray(params["ln_b"], jnp.float32).reshape(1, d_model),
    }


def _pick_block_b(sz_b, len_q, len_k, n_head, d_k, d_v, d_model):
    """Largest divisor of sz_b whose working set fits comfortably, targeting
    >= 256 rows in the projection / fc matmuls."""
    budget = 24 * 1024 * 1024
    best = 1
    for bt in range(1, sz_b + 1):
        if sz_b % bt:
            continue
        rows_q, rows_k = bt * len_q, bt * len_k
        acts = 4 * (rows_q * (3 * d_model + n_head * (d_k + d_v))
                    + rows_k * (2 * d_model + n_head * (d_k + d_v)))
        scores = 4 * bt * n_head * len_q * len_k * 4
        if acts + scores > budget:
            break
        best = bt
        if rows_q >= 256:
            break
    return best


def _vmem_limit_bytes(bt, len_q, len_k, n_head, d_k, d_v, d_model):
    """Per-step working set estimate, clamped to stay inside v7x's 64 MiB."""
    f32, bf16 = 4, 2
    rows_q, rows_k = bt * len_q, bt * len_k
    weights = bf16 * (2 * d_model * n_head * d_k + 2 * d_model * n_head * d_v)
    acts = f32 * (rows_q * (3 * d_model + 2 * n_head * (d_k + d_v))
                  + rows_k * (2 * d_model + 2 * n_head * (d_k + d_v)))
    scores = f32 * bt * n_head * len_q * len_k * 4
    est = 2 * (acts + scores) + 2 * weights          # double-buffered blocks + headroom
    return int(min(max(est, 32 * 1024 * 1024), 48 * 1024 * 1024))


# ---------------------------------------------------------------------------
# Wrapper: full MultiHeadAttention forward in a single pallas_call.
# ---------------------------------------------------------------------------
def multi_head_attention(prep, q, k, v, mask, *, return_attn=True,
                         attn_dtype=jnp.float32, block_b=None):
    """q:(B,Lq,D) k,v:(B,Lk,D) mask:(B,Lq,Lk) with True/1 == masked position."""
    n_head, d_k, d_v = prep["n_head"], prep["d_k"], prep["d_v"]
    d_model = prep["d_model"]
    sz_b, len_q, _ = q.shape
    len_k = k.shape[1]

    if block_b is None:
        block_b = _pick_block_b(sz_b, len_q, len_k, n_head, d_k, d_v, d_model)
    assert sz_b % block_b == 0
    grid = (sz_b // block_b,)

    mask_i8 = mask.astype(jnp.int8)   # int8: 4x less DMA than f32, shared by all heads

    kernel = functools.partial(
        _mha_fused_kernel, n_head=n_head, d_k=d_k, d_v=d_v,
        inv_temp=1.0 / math.sqrt(float(d_k)), eps=1e-5)

    def _const(shape):                # whole-array block, constant across the grid
        n = len(shape)
        return pl.BlockSpec(shape, lambda b: (0,) * n)

    in_specs = [
        pl.BlockSpec((block_b, len_q, d_model), lambda b: (b, 0, 0)),   # q (residual)
        pl.BlockSpec((block_b, len_k, d_model), lambda b: (b, 0, 0)),   # k
        pl.BlockSpec((block_b, len_k, d_model), lambda b: (b, 0, 0)),   # v
        pl.BlockSpec((block_b, len_q, len_k), lambda b: (b, 0, 0)),     # mask (int8)
        _const((d_model, n_head * d_k)),                                # w_qs^T (bf16)
        _const((1, n_head * d_k)),                                      # b_qs
        _const((d_model, n_head * d_k)),                                # w_ks^T (bf16)
        _const((1, n_head * d_k)),                                      # b_ks
        _const((d_model, n_head * d_v)),                                # w_vs^T (bf16)
        _const((1, n_head * d_v)),                                      # b_vs
        _const((n_head * d_v, d_model)),                                # fc^T (bf16)
        _const((1, d_model)),                                           # fc bias
        _const((1, d_model)),                                           # LN gamma
        _const((1, d_model)),                                           # LN beta
    ]

    out_shapes = [jax.ShapeDtypeStruct((sz_b, len_q, d_model), jnp.float32)]
    out_specs = [pl.BlockSpec((block_b, len_q, d_model), lambda b: (b, 0, 0))]
    if return_attn:
        out_shapes.append(
            jax.ShapeDtypeStruct((n_head, sz_b, len_q, len_k), attn_dtype))
        out_specs.append(
            pl.BlockSpec((n_head, block_b, len_q, len_k), lambda b: (0, b, 0, 0)))

    results = pl.pallas_call(
        kernel,
        out_shape=tuple(out_shapes),
        grid=grid,
        in_specs=in_specs,
        out_specs=tuple(out_specs),
        compiler_params=pltpu.CompilerParams(
            dimension_semantics=("parallel",),     # v7x: 2 TensorCores split the batch grid
            vmem_limit_bytes=_vmem_limit_bytes(
                block_b, len_q, len_k, n_head, d_k, d_v, d_model),
        ),
    )(q, k, v, mask_i8,
      prep["wq_t"], prep["bq"], prep["wk_t"], prep["bk"], prep["wv_t"], prep["bv"],
      prep["wo_t"], prep["bo"], prep["ln_g"], prep["ln_b"])

    out = results[0]
    if not return_attn:
        return out, None
    # (H, B, Lq, Lk) -> (H*B, Lq, Lk): free contiguous view, matches torch's
    # permute(2,0,1,3).view(-1, ...) head-major ordering of the returned attn.
    attn = results[1].reshape(n_head * sz_b, len_q, len_k)
    return out, attn


# ---------------------------------------------------------------------------
# Pure-JAX reference (PyTorch semantics) for a sanity check.
# ---------------------------------------------------------------------------
def reference_mha(params, q, k, v, mask):
    n_head, d_k, d_v = params["n_head"], params["d_k"], params["d_v"]
    sz_b, len_q, d_model = q.shape
    len_k = k.shape[1]
    residual = q
    lin = lambda x, w, b: x @ w.T + b
    qf = lin(q, params["w_qs_w"], params["w_qs_b"]).reshape(sz_b, len_q, n_head, d_k)
    kf = lin(k, params["w_ks_w"], params["w_ks_b"]).reshape(sz_b, len_k, n_head, d_k)
    vf = lin(v, params["w_vs_w"], params["w_vs_b"]).reshape(sz_b, len_k, n_head, d_v)
    qh = qf.transpose(2, 0, 1, 3).reshape(-1, len_q, d_k)
    kh = kf.transpose(2, 0, 1, 3).reshape(-1, len_k, d_k)
    vh = vf.transpose(2, 0, 1, 3).reshape(-1, len_k, d_v)
    m = jnp.tile(mask, (n_head, 1, 1))
    s = jnp.einsum("bqd,bkd->bqk", qh, kh) / math.sqrt(float(d_k))
    s = jnp.where(m, -jnp.inf, s)
    s = s - jnp.max(s, axis=-1, keepdims=True)
    e = jnp.exp(s)
    attn = e / jnp.sum(e, axis=-1, keepdims=True)
    o = jnp.einsum("bqk,bkd->bqd", attn, vh)
    o = o.reshape(n_head, sz_b, len_q, d_v).transpose(1, 2, 0, 3).reshape(sz_b, len_q, -1)
    o = o @ params["fc_w"].T + params["fc_b"]
    y = o + residual
    mean = jnp.mean(y, axis=-1, keepdims=True)
    var = jnp.mean((y - mean) ** 2, axis=-1, keepdims=True)
    y = (y - mean) / jnp.sqrt(var + 1e-5) * params["ln_w"] + params["ln_b"]
    return y, attn


def init_params(key, n_head, d_model, d_k, d_v):
    ks = jax.random.split(key, 8)
    std_qk = math.sqrt(2.0 / (d_model + d_k))
    std_v = math.sqrt(2.0 / (d_model + d_v))
    std_fc = math.sqrt(2.0 / (n_head * d_v + d_model))  # xavier_normal_
    bound = 1.0 / math.sqrt(d_model)
    return {
        "n_head": n_head, "d_k": d_k, "d_v": d_v,
        "w_qs_w": std_qk * jax.random.normal(ks[0], (n_head * d_k, d_model), jnp.float32),
        "w_qs_b": jax.random.uniform(ks[1], (n_head * d_k,), jnp.float32, -bound, bound),
        "w_ks_w": std_qk * jax.random.normal(ks[2], (n_head * d_k, d_model), jnp.float32),
        "w_ks_b": jax.random.uniform(ks[3], (n_head * d_k,), jnp.float32, -bound, bound),
        "w_vs_w": std_v * jax.random.normal(ks[4], (n_head * d_v, d_model), jnp.float32),
        "w_vs_b": jax.random.uniform(ks[5], (n_head * d_v,), jnp.float32, -bound, bound),
        "fc_w": std_fc * jax.random.normal(ks[6], (d_model, n_head * d_v), jnp.float32),
        "fc_b": jnp.zeros((d_model,), jnp.float32),
        "ln_w": jnp.ones((d_model,), jnp.float32),
        "ln_b": jnp.zeros((d_model,), jnp.float32),
    }


if __name__ == "__main__":
    n_head, d_model, d_k, d_v = 4, 32, 8, 8
    sz_b, seq = 2, 8

    key = jax.random.PRNGKey(0)
    kp, kq, kk, kv = jax.random.split(key, 4)
    params = init_params(kp, n_head, d_model, d_k, d_v)
    prep = prepare_mha_params(params)          # one-time weight prep (bf16 weights)

    q = jax.random.normal(kq, (sz_b, seq, d_model), jnp.float32)
    k = jax.random.normal(kk, (sz_b, seq, d_model), jnp.float32)
    v = jax.random.normal(kv, (sz_b, seq, d_model), jnp.float32)
    # causal mask: True == masked (future positions), no fully-masked rows
    causal = jnp.triu(jnp.ones((seq, seq), jnp.bool_), k=1)
    mask = jnp.broadcast_to(causal, (sz_b, seq, seq))

    out, attn = multi_head_attention(prep, q, k, v, mask)
    out = jax.block_until_ready(out)
    attn = jax.block_until_ready(attn)

    ref_out, ref_attn = reference_mha(params, q, k, v, mask)
    assert out.shape == (sz_b, seq, d_model)
    assert attn.shape == (n_head * sz_b, seq, seq)
    # tolerances accommodate bf16 MXU operands + pl.reciprocal(approx=True)
    assert jnp.allclose(out, ref_out, atol=5e-2, rtol=5e-2), "output mismatch vs reference"
    assert jnp.allclose(attn, ref_attn, atol=3e-2, rtol=5e-2), "attn mismatch vs reference"

    print("KERNEL_OK")
</pallas_src>

<mosaic_0001>
module attributes {stable_mosaic.version = 11 : i64} {
  func.func @_mha_fused_kernel(%arg0: i32, %arg1: memref<2x8x32xf32, #tpu.memory_space<vmem>>, %arg2: memref<2x8x32xf32, #tpu.memory_space<vmem>>, %arg3: memref<2x8x32xf32, #tpu.memory_space<vmem>>, %arg4: memref<2x8x8xi8, #tpu.memory_space<vmem>>, %arg5: memref<32x32xbf16, #tpu.memory_space<vmem>>, %arg6: memref<1x32xf32, #tpu.memory_space<vmem>>, %arg7: memref<32x32xbf16, #tpu.memory_space<vmem>>, %arg8: memref<1x32xf32, #tpu.memory_space<vmem>>, %arg9: memref<32x32xbf16, #tpu.memory_space<vmem>>, %arg10: memref<1x32xf32, #tpu.memory_space<vmem>>, %arg11: memref<32x32xbf16, #tpu.memory_space<vmem>>, %arg12: memref<1x32xf32, #tpu.memory_space<vmem>>, %arg13: memref<1x32xf32, #tpu.memory_space<vmem>>, %arg14: memref<1x32xf32, #tpu.memory_space<vmem>>, %arg15: memref<2x8x32xf32, #tpu.memory_space<vmem>>, %arg16: memref<4x2x8x8xf32, #tpu.memory_space<vmem>>) attributes {dimension_semantics = [#tpu.dimension_semantics<parallel>], iteration_bounds = array<i64: 1>, scalar_prefetch = 0 : i64, scratch_operands = 0 : i64, tpu.core_type = #tpu.core_type<tc>, window_params = [{transform_indices = @transform_0, window_bounds = array<i64: 2, 8, 32>}, {transform_indices = @transform_1, window_bounds = array<i64: 2, 8, 32>}, {transform_indices = @transform_2, window_bounds = array<i64: 2, 8, 32>}, {transform_indices = @transform_3, window_bounds = array<i64: 2, 8, 8>}, {pipeline_mode = #tpu.pipeline_mode<synchronous>, transform_indices = @transform_4, window_bounds = array<i64: 32, 32>}, {pipeline_mode = #tpu.pipeline_mode<synchronous>, transform_indices = @transform_5, window_bounds = array<i64: 1, 32>}, {pipeline_mode = #tpu.pipeline_mode<synchronous>, transform_indices = @transform_6, window_bounds = array<i64: 32, 32>}, {pipeline_mode = #tpu.pipeline_mode<synchronous>, transform_indices = @transform_7, window_bounds = array<i64: 1, 32>}, {pipeline_mode = #tpu.pipeline_mode<synchronous>, transform_indices = @transform_8, window_bounds = array<i64: 32, 32>}, {pipeline_mode = #tpu.pipeline_mode<synchronous>, transform_indices = @transform_9, window_bounds = array<i64: 1, 32>}, {pipeline_mode = #tpu.pipeline_mode<synchronous>, transform_indices = @transform_10, window_bounds = array<i64: 32, 32>}, {pipeline_mode = #tpu.pipeline_mode<synchronous>, transform_indices = @transform_11, window_bounds = array<i64: 1, 32>}, {pipeline_mode = #tpu.pipeline_mode<synchronous>, transform_indices = @transform_12, window_bounds = array<i64: 1, 32>}, {pipeline_mode = #tpu.pipeline_mode<synchronous>, transform_indices = @transform_13, window_bounds = array<i64: 1, 32>}, {transform_indices = @transform_14, window_bounds = array<i64: 2, 8, 32>}, {transform_indices = @transform_15, window_bounds = array<i64: 4, 2, 8, 8>}]} {
    %c0 = arith.constant 0 : index
    %c0_0 = arith.constant 0 : index
    %c0_1 = arith.constant 0 : index
    %0 = vector.load %arg1[%c0, %c0_0, %c0_1] : memref<2x8x32xf32, #tpu.memory_space<vmem>>, vector<2x8x32xf32>
    %1 = vector.shape_cast %0 : vector<2x8x32xf32> to vector<16x32xf32>
    %c0_2 = arith.constant 0 : index
    %c0_3 = arith.constant 0 : index
    %c0_4 = arith.constant 0 : index
    %2 = vector.load %arg2[%c0_2, %c0_3, %c0_4] : memref<2x8x32xf32, #tpu.memory_space<vmem>>, vector<2x8x32xf32>
    %3 = vector.shape_cast %2 : vector<2x8x32xf32> to vector<16x32xf32>
    %c0_5 = arith.constant 0 : index
    %c0_6 = arith.constant 0 : index
    %c0_7 = arith.constant 0 : index
    %4 = vector.load %arg3[%c0_5, %c0_6, %c0_7] : memref<2x8x32xf32, #tpu.memory_space<vmem>>, vector<2x8x32xf32>
    %5 = vector.shape_cast %4 : vector<2x8x32xf32> to vector<16x32xf32>
    %6 = arith.truncf %1 : vector<16x32xf32> to vector<16x32xbf16>
    %c0_8 = arith.constant 0 : index
    %c0_9 = arith.constant 0 : index
    %7 = vector.load %arg5[%c0_8, %c0_9] : memref<32x32xbf16, #tpu.memory_space<vmem>>, vector<32x32xbf16>
    %cst = arith.constant dense<0.000000e+00> : vector<16x32xf32>
    %8 = tpu.matmul %6, %7, %cst {dimension_numbers = #tpu.dot_dimension_numbers<[1], [0], [0], [1], [0, 0, 1, 1], [], []>} : vector<16x32xbf16>, vector<32x32xbf16>, vector<16x32xf32> -> vector<16x32xf32>
    %c0_10 = arith.constant 0 : index
    %c0_11 = arith.constant 0 : index
    %9 = vector.load %arg6[%c0_10, %c0_11] : memref<1x32xf32, #tpu.memory_space<vmem>>, vector<1x32xf32>
    %10 = vector.broadcast %9 : vector<1x32xf32> to vector<16x32xf32>
    %11 = arith.addf %8, %10 : vector<16x32xf32>
    %12 = arith.truncf %3 : vector<16x32xf32> to vector<16x32xbf16>
    %c0_12 = arith.constant 0 : index
    %c0_13 = arith.constant 0 : index
    %13 = vector.load %arg7[%c0_12, %c0_13] : memref<32x32xbf16, #tpu.memory_space<vmem>>, vector<32x32xbf16>
    %cst_14 = arith.constant dense<0.000000e+00> : vector<16x32xf32>
    %14 = tpu.matmul %12, %13, %cst_14 {dimension_numbers = #tpu.dot_dimension_numbers<[1], [0], [0], [1], [0, 0, 1, 1], [], []>} : vector<16x32xbf16>, vector<32x32xbf16>, vector<16x32xf32> -> vector<16x32xf32>
    %c0_15 = arith.constant 0 : index
    %c0_16 = arith.constant 0 : index
    %15 = vector.load %arg8[%c0_15, %c0_16] : memref<1x32xf32, #tpu.memory_space<vmem>>, vector<1x32xf32>
    %16 = vector.broadcast %15 : vector<1x32xf32> to vector<16x32xf32>
    %17 = arith.addf %14, %16 : vector<16x32xf32>
    %18 = arith.truncf %5 : vector<16x32xf32> to vector<16x32xbf16>
    %c0_17 = arith.constant 0 : index
    %c0_18 = arith.constant 0 : index
    %19 = vector.load %arg9[%c0_17, %c0_18] : memref<32x32xbf16, #tpu.memory_space<vmem>>, vector<32x32xbf16>
    %cst_19 = arith.constant dense<0.000000e+00> : vector<16x32xf32>
    %20 = tpu.matmul %18, %19, %cst_19 {dimension_numbers = #tpu.dot_dimension_numbers<[1], [0], [0], [1], [0, 0, 1, 1], [], []>} : vector<16x32xbf16>, vector<32x32xbf16>, vector<16x32xf32> -> vector<16x32xf32>
    %c0_20 = arith.constant 0 : index
    %c0_21 = arith.constant 0 : index
    %21 = vector.load %arg10[%c0_20, %c0_21] : memref<1x32xf32, #tpu.memory_space<vmem>>, vector<1x32xf32>
    %22 = vector.broadcast %21 : vector<1x32xf32> to vector<16x32xf32>
    %23 = arith.addf %20, %22 : vector<16x32xf32>
    %cst_22 = arith.constant 0.353553385 : f32
    %24 = vector.broadcast %cst_22 : f32 to vector<16x32xf32>
    %25 = arith.mulf %11, %24 : vector<16x32xf32>
    %26 = vector.shape_cast %25 : vector<16x32xf32> to vector<2x8x4x8xf32>
    %27 = tpu.transpose %26, [0, 2, 1, 3] : vector<2x8x4x8xf32> -> vector<2x4x8x8xf32>
    %28 = vector.shape_cast %27 : vector<2x4x8x8xf32> to vector<8x8x8xf32>
    %29 = arith.truncf %28 : vector<8x8x8xf32> to vector<8x8x8xbf16>
    %30 = vector.shape_cast %17 : vector<16x32xf32> to vector<2x8x4x8xf32>
    %31 = tpu.transpose %30, [0, 2, 1, 3] : vector<2x8x4x8xf32> -> vector<2x4x8x8xf32>
    %32 = vector.shape_cast %31 : vector<2x4x8x8xf32> to vector<8x8x8xf32>
    %33 = arith.truncf %32 : vector<8x8x8xf32> to vector<8x8x8xbf16>
    %34 = vector.shape_cast %23 : vector<16x32xf32> to vector<2x8x4x8xf32>
    %35 = tpu.transpose %34, [0, 2, 1, 3] : vector<2x8x4x8xf32> -> vector<2x4x8x8xf32>
    %36 = vector.shape_cast %35 : vector<2x4x8x8xf32> to vector<8x8x8xf32>
    %37 = arith.truncf %36 : vector<8x8x8xf32> to vector<8x8x8xbf16>
    "tpu.trace_start"() <{level = 10 : i32, message = "zqd,zkd->zqk"}> : () -> ()
    %cst_23 = arith.constant dense<0.000000e+00> : vector<8x8x8xf32>
    %38 = tpu.matmul %29, %33, %cst_23 {dimension_numbers = #tpu.dot_dimension_numbers<[2], [2], [1], [1], [0, 0, 0, 1, 1, 1], [0], [0]>} : vector<8x8x8xbf16>, vector<8x8x8xbf16>, vector<8x8x8xf32> -> vector<8x8x8xf32>
    "tpu.trace_stop"() : () -> ()
    %39 = vector.shape_cast %38 : vector<8x8x8xf32> to vector<2x4x8x8xf32>
    %c0_24 = arith.constant 0 : index
    %c0_25 = arith.constant 0 : index
    %c0_26 = arith.constant 0 : index
    %40 = vector.load %arg4[%c0_24, %c0_25, %c0_26] : memref<2x8x8xi8, #tpu.memory_space<vmem>>, vector<2x8x8xi8>
    %c0_i8 = arith.constant 0 : i8
    %41 = vector.broadcast %c0_i8 : i8 to vector<2x8x8xi8>
    %42 = arith.cmpi ne, %40, %41 : vector<2x8x8xi8>
    %43 = vector.shape_cast %42 : vector<2x8x8xi1> to vector<2x1x8x8xi1>
    %cst_27 = arith.constant -1.000000e+30 : f32
    %44 = vector.shape_cast %43 : vector<2x1x8x8xi1> to vector<2x1x8x8xi1>
    %45 = vector.broadcast %44 : vector<2x1x8x8xi1> to vector<2x4x8x8xi1>
    %46 = vector.broadcast %cst_27 : f32 to vector<2x4x8x8xf32>
    %47 = arith.select %45, %46, %39 : vector<2x4x8x8xi1>, vector<2x4x8x8xf32>
    %cst_28 = arith.constant dense<0xFF800000> : vector<2x4x8xf32>
    %48 = vector.multi_reduction <maximumf>, %47, %cst_28 [3] : vector<2x4x8x8xf32> to vector<2x4x8xf32>
    %49 = vector.shape_cast %48 : vector<2x4x8xf32> to vector<2x4x8x1xf32>
    %50 = vector.broadcast %49 : vector<2x4x8x1xf32> to vector<2x4x8x8xf32>
    %51 = arith.subf %47, %50 : vector<2x4x8x8xf32>
    %52 = math.exp %51 : vector<2x4x8x8xf32>
    %cst_29 = arith.constant dense<0.000000e+00> : vector<2x4x8xf32>
    %53 = vector.multi_reduction <add>, %52, %cst_29 [3] : vector<2x4x8x8xf32> to vector<2x4x8xf32>
    %54 = vector.shape_cast %53 : vector<2x4x8xf32> to vector<2x4x8x1xf32>
    %55 = tpu.reciprocal %54 {approx = true} : vector<2x4x8x1xf32> -> vector<2x4x8x1xf32>
    %56 = vector.broadcast %55 : vector<2x4x8x1xf32> to vector<2x4x8x8xf32>
    %57 = arith.mulf %52, %56 : vector<2x4x8x8xf32>
    %58 = tpu.transpose %57, [1, 0, 2, 3] : vector<2x4x8x8xf32> -> vector<4x2x8x8xf32>
    %c0_30 = arith.constant 0 : index
    %c0_31 = arith.constant 0 : index
    %c0_32 = arith.constant 0 : index
    %c0_33 = arith.constant 0 : index
    %59 = vector.load %arg16[%c0_30, %c0_31, %c0_32, %c0_33] : memref<4x2x8x8xf32, #tpu.memory_space<vmem>>, vector<4x2x8x8xf32>
    tpu.vector_store %arg16[%c0_30, %c0_31, %c0_32, %c0_33], %58 {strides = array<i32>} : memref<4x2x8x8xf32, #tpu.memory_space<vmem>>, vector<4x2x8x8xf32>,
    %60 = vector.shape_cast %57 : vector<2x4x8x8xf32> to vector<8x8x8xf32>
    %61 = arith.truncf %60 : vector<8x8x8xf32> to vector<8x8x8xbf16>
    "tpu.trace_start"() <{level = 10 : i32, message = "zqk,zkd->zqd"}> : () -> ()
    %cst_34 = arith.constant dense<0.000000e+00> : vector<8x8x8xf32>
    %62 = tpu.matmul %61, %37, %cst_34 {dimension_numbers = #tpu.dot_dimension_numbers<[2], [1], [1], [2], [0, 0, 0, 1, 1, 2], [0], [0]>} : vector<8x8x8xbf16>, vector<8x8x8xbf16>, vector<8x8x8xf32> -> vector<8x8x8xf32>
    "tpu.trace_stop"() : () -> ()
    %63 = vector.shape_cast %62 : vector<8x8x8xf32> to vector<2x4x8x8xf32>
    %64 = tpu.transpose %63, [0, 2, 1, 3] : vector<2x4x8x8xf32> -> vector<2x8x4x8xf32>
    %65 = vector.shape_cast %64 : vector<2x8x4x8xf32> to vector<16x32xf32>
    %66 = arith.truncf %65 : vector<16x32xf32> to vector<16x32xbf16>
    %c0_35 = arith.constant 0 : index
    %c0_36 = arith.constant 0 : index
    %67 = vector.load %arg11[%c0_35, %c0_36] : memref<32x32xbf16, #tpu.memory_space<vmem>>, vector<32x32xbf16>
    %cst_37 = arith.constant dense<0.000000e+00> : vector<16x32xf32>
    %68 = tpu.matmul %66, %67, %cst_37 {dimension_numbers = #tpu.dot_dimension_numbers<[1], [0], [0], [1], [0, 0, 1, 1], [], []>} : vector<16x32xbf16>, vector<32x32xbf16>, vector<16x32xf32> -> vector<16x32xf32>
    %c0_38 = arith.constant 0 : index
    %c0_39 = arith.constant 0 : index
    %69 = vector.load %arg12[%c0_38, %c0_39] : memref<1x32xf32, #tpu.memory_space<vmem>>, vector<1x32xf32>
    %70 = vector.broadcast %69 : vector<1x32xf32> to vector<16x32xf32>
    %71 = arith.addf %68, %70 : vector<16x32xf32>
    %72 = arith.addf %71, %1 : vector<16x32xf32>
    %cst_40 = arith.constant dense<0.000000e+00> : vector<16xf32>
    %73 = vector.multi_reduction <add>, %72, %cst_40 [1] : vector<16x32xf32> to vector<16xf32>
    %74 = vector.shape_cast %73 : vector<16xf32> to vector<16x1xf32>
    %cst_41 = arith.constant 3.125000e-02 : f32
    %75 = vector.broadcast %cst_41 : f32 to vector<16x1xf32>
    %76 = arith.mulf %74, %75 : vector<16x1xf32>
    %77 = arith.mulf %72, %72 : vector<16x32xf32>
    %cst_42 = arith.constant dense<0.000000e+00> : vector<16xf32>
    %78 = vector.multi_reduction <add>, %77, %cst_42 [1] : vector<16x32xf32> to vector<16xf32>
    %79 = vector.shape_cast %78 : vector<16xf32> to vector<16x1xf32>
    %cst_43 = arith.constant 3.125000e-02 : f32
    %80 = vector.broadcast %cst_43 : f32 to vector<16x1xf32>
    %81 = arith.mulf %79, %80 : vector<16x1xf32>
    %82 = arith.mulf %76, %76 : vector<16x1xf32>
    %83 = arith.subf %81, %82 : vector<16x1xf32>
    %84 = vector.broadcast %76 : vector<16x1xf32> to vector<16x32xf32>
    %85 = arith.subf %72, %84 : vector<16x32xf32>
    %cst_44 = arith.constant 9.99999974E-6 : f32
    %86 = vector.broadcast %cst_44 : f32 to vector<16x1xf32>
    %87 = arith.addf %83, %86 : vector<16x1xf32>
    %88 = math.rsqrt %87 : vector<16x1xf32>
    %89 = vector.broadcast %88 : vector<16x1xf32> to vector<16x32xf32>
    %90 = arith.mulf %85, %89 : vector<16x32xf32>
    %c0_45 = arith.constant 0 : index
    %c0_46 = arith.constant 0 : index
    %91 = vector.load %arg13[%c0_45, %c0_46] : memref<1x32xf32, #tpu.memory_space<vmem>>, vector<1x32xf32>
    %92 = vector.broadcast %91 : vector<1x32xf32> to vector<16x32xf32>
    %93 = arith.mulf %90, %92 : vector<16x32xf32>
    %c0_47 = arith.constant 0 : index
    %c0_48 = arith.constant 0 : index
    %94 = vector.load %arg14[%c0_47, %c0_48] : memref<1x32xf32, #tpu.memory_space<vmem>>, vector<1x32xf32>
    %95 = vector.broadcast %94 : vector<1x32xf32> to vector<16x32xf32>
    %96 = arith.addf %93, %95 : vector<16x32xf32>
    %97 = vector.shape_cast %96 : vector<16x32xf32> to vector<2x8x32xf32>
    %c0_49 = arith.constant 0 : index
    %c0_50 = arith.constant 0 : index
    %c0_51 = arith.constant 0 : index
    %98 = vector.load %arg15[%c0_49, %c0_50, %c0_51] : memref<2x8x32xf32, #tpu.memory_space<vmem>>, vector<2x8x32xf32>
    tpu.vector_store %arg15[%c0_49, %c0_50, %c0_51], %97 {strides = array<i32>} : memref<2x8x32xf32, #tpu.memory_space<vmem>>, vector<2x8x32xf32>,
    return
  }
  func.func @transform_0(%arg0: i32) -> (i32, i32, i32) {
    %c0_i32 = arith.constant 0 : i32
    %c0_i32_0 = arith.constant 0 : i32
    %c0_i32_1 = arith.constant 0 : i32
    return %arg0, %c0_i32, %c0_i32_0 : i32, i32, i32
  }
  func.func @transform_1(%arg0: i32) -> (i32, i32, i32) {
    %c0_i32 = arith.constant 0 : i32
    %c0_i32_0 = arith.constant 0 : i32
    %c0_i32_1 = arith.constant 0 : i32
    return %arg0, %c0_i32, %c0_i32_0 : i32, i32, i32
  }
  func.func @transform_2(%arg0: i32) -> (i32, i32, i32) {
    %c0_i32 = arith.constant 0 : i32
    %c0_i32_0 = arith.constant 0 : i32
    %c0_i32_1 = arith.constant 0 : i32
    return %arg0, %c0_i32, %c0_i32_0 : i32, i32, i32
  }
  func.func @transform_3(%arg0: i32) -> (i32, i32, i32) {
    %c0_i32 = arith.constant 0 : i32
    %c0_i32_0 = arith.constant 0 : i32
    %c0_i32_1 = arith.constant 0 : i32
    return %arg0, %c0_i32, %c0_i32_0 : i32, i32, i32
  }
  func.func @transform_4(%arg0: i32) -> (i32, i32) {
    %c0_i32 = arith.constant 0 : i32
    %c0_i32_0 = arith.constant 0 : i32
    %c0_i32_1 = arith.constant 0 : i32
    return %c0_i32, %c0_i32_0 : i32, i32
  }
  func.func @transform_5(%arg0: i32) -> (i32, i32) {
    %c0_i32 = arith.constant 0 : i32
    %c0_i32_0 = arith.constant 0 : i32
    %c0_i32_1 = arith.constant 0 : i32
    return %c0_i32, %c0_i32_0 : i32, i32
  }
  func.func @transform_6(%arg0: i32) -> (i32, i32) {
    %c0_i32 = arith.constant 0 : i32
    %c0_i32_0 = arith.constant 0 : i32
    %c0_i32_1 = arith.constant 0 : i32
    return %c0_i32, %c0_i32_0 : i32, i32
  }
  func.func @transform_7(%arg0: i32) -> (i32, i32) {
    %c0_i32 = arith.constant 0 : i32
    %c0_i32_0 = arith.constant 0 : i32
    %c0_i32_1 = arith.constant 0 : i32
    return %c0_i32, %c0_i32_0 : i32, i32
  }
  func.func @transform_8(%arg0: i32) -> (i32, i32) {
    %c0_i32 = arith.constant 0 : i32
    %c0_i32_0 = arith.constant 0 : i32
    %c0_i32_1 = arith.constant 0 : i32
    return %c0_i32, %c0_i32_0 : i32, i32
  }
  func.func @transform_9(%arg0: i32) -> (i32, i32) {
    %c0_i32 = arith.constant 0 : i32
    %c0_i32_0 = arith.constant 0 : i32
    %c0_i32_1 = arith.constant 0 : i32
    return %c0_i32, %c0_i32_0 : i32, i32
  }
  func.func @transform_10(%arg0: i32) -> (i32, i32) {
    %c0_i32 = arith.constant 0 : i32
    %c0_i32_0 = arith.constant 0 : i32
    %c0_i32_1 = arith.constant 0 : i32
    return %c0_i32, %c0_i32_0 : i32, i32
  }
  func.func @transform_11(%arg0: i32) -> (i32, i32) {
    %c0_i32 = arith.constant 0 : i32
    %c0_i32_0 = arith.constant 0 : i32
    %c0_i32_1 = arith.constant 0 : i32
    return %c0_i32, %c0_i32_0 : i32, i32
  }
  func.func @transform_12(%arg0: i32) -> (i32, i32) {
    %c0_i32 = arith.constant 0 : i32
    %c0_i32_0 = arith.constant 0 : i32
    %c0_i32_1 = arith.constant 0 : i32
    return %c0_i32, %c0_i32_0 : i32, i32
  }
  func.func @transform_13(%arg0: i32) -> (i32, i32) {
    %c0_i32 = arith.constant 0 : i32
    %c0_i32_0 = arith.constant 0 : i32
    %c0_i32_1 = arith.constant 0 : i32
    return %c0_i32, %c0_i32_0 : i32, i32
  }
  func.func @transform_14(%arg0: i32) -> (i32, i32, i32) {
    %c0_i32 = arith.constant 0 : i32
    %c0_i32_0 = arith.constant 0 : i32
    %c0_i32_1 = arith.constant 0 : i32
    return %arg0, %c0_i32, %c0_i32_0 : i32, i32, i32
  }
  func.func @transform_15(%arg0: i32) -> (i32, i32, i32, i32) {
    %c0_i32 = arith.constant 0 : i32
    %c0_i32_0 = arith.constant 0 : i32
    %c0_i32_1 = arith.constant 0 : i32
    %c0_i32_2 = arith.constant 0 : i32
    return %c0_i32, %arg0, %c0_i32_0, %c0_i32_1 : i32, i32, i32, i32
  }
}

</mosaic_0001>

<bundles_post_ra>
// kernel: tpu_custom_call.1
= control target key start
LH: loop header
LB: loop body
LE: loop exit
PB: predicated region body
PF: predicated region fallthrough
CT: control target
= control target key end

     0   :  { %21 = vsyncpa [#allocation3], 0  ;;  %s3824_s0 = inlined_call_operand.hbm [shape: f32[2,8,32], index: 0, kind: input, shape index: {}]   ;;  %s3825_s1 = inlined_call_operand.hbm [shape: f32[2,8,32], index: 1, kind: input, shape index: {}]   ;;  %s3826_s2 = inlined_call_operand.hbm [shape: f32[2,8,32], index: 2, kind: input, shape index: {}]   ;;  %s3827_s3 = inlined_call_operand.hbm [shape: s8[2,8,8], index: 3, kind: input, shape index: {}]   ;;  %s3828_s4 = inlined_call_operand.hbm [shape: bf16[32,32], index: 4, kind: input, shape index: {}]   ;;  %s3829_s5 = inlined_call_operand.vmem [shape: f32[1,32], index: 5, kind: input, shape index: {}]   ;;  %s3830_s6 = inlined_call_operand.vmem [shape: bf16[32,32], index: 6, kind: input, shape index: {}]   ;;  %s3831_s7 = inlined_call_operand.vmem [shape: f32[1,32], index: 7, kind: input, shape index: {}]   ;;  %s3832_s8 = inlined_call_operand.hbm [shape: bf16[32,32], index: 8, kind: input, shape index: {}]   ;;  %s3833_s9 = inlined_call_operand.hbm [shape: f32[1,32], index: 9, kind: input, shape index: {}]   ;;  %s3834_s10 = inlined_call_operand.vmem [shape: bf16[32,32], index: 10, kind: input, shape index: {}]   ;;  %s3835_s11 = inlined_call_operand.vmem [shape: f32[1,32], index: 11, kind: input, shape index: {}]   ;;  %s3836_s12 = inlined_call_operand.vmem [shape: f32[1,32], index: 12, kind: input, shape index: {}]   ;;  %s3837_s13 = inlined_call_operand.vmem [shape: f32[1,32], index: 13, kind: input, shape index: {}]   ;;  %s3838_s14 = inlined_call_operand.hbm [shape: f32[2,8,32], index: 14, kind: output, shape index: {0}]   ;;  %s3839_s15 = inlined_call_operand.hbm [shape: f32[4,2,8,8], index: 15, kind: output, shape index: {1}]  }
   0x1   :  { %22 = vsyncpa [#allocation6], 0 }
   0x2   :  { %23 = vsyncpa [#allocation9], 0 }
   0x3   :  { %24 = vsyncpa [#allocation12], 0 }
   0x4   :  { %25 = vsyncpa [#allocation4], 0 }
   0x5   :  { %26 = vsyncpa [#allocation16], 0  ;;  %s3102_s18 = smov [#allocation5]   ;;  %s3103_s20 = smov [#allocation8]  }
   0x6   :  { %s44_s19 = sshll.u32 %s3102_s18, 4  ;;  %s68_s21 = sshll.u32 %s3103_s20, 4  ;;  %s45_s19 = int_to_ptr.vmem [resolvable:$true] %s44_s19  ;;  %s3207_s21 = int_to_ptr.vmem [resolvable:$true] %s68_s21 }
   0x7   :  { %s2892_s24 = scalar_lea.hbm %s3825_s1, 256 }
   0x8   :  { %p2893_p0 = scmp.ne.s32.totalorder %s3825_s1, %s2892_s24  ;;  %p2896_p1 = scmp.lt.u32.totalorder %s2892_s24, %s3825_s1 }
   0xa   :  { %p2898_p2 = pnand %p2896_p1, %p2893_p0 }
   0xc   :  { %2901 = shalt.err (!%p2898_p2)
}
   0xd   :  { %s2902_s29 = scalar_lea.vmem %s45_s19, 256  ;;  %p2907_p4 = scmp.lt.s32.totalorder %s45_s19, %s45_s19 }
   0xe   :  { %p2903_p3 = scmp.ne.s32.totalorder %s45_s19, %s2902_s29  ;;  %p2908_p5 = scmp.lt.s32.totalorder %s2902_s29, %s2902_s29 }
  0x10   :  { %p2909_p6 = por %p2908_p5, %p2907_p4 }
  0x12   :  { %p2910_p7 = pnand %p2909_p6, %p2903_p3 }
  0x14   :  { %2913 = shalt.err (!%p2910_p7)
}
  0x15   :  { %s3840_s30 = smov 128   ;;  %s3842_s16 = smov 8  }
  0x16   :  { %50 = dma.hbm_to_vmem [thread:$0]  %s3825_s1, 256, %s45_s19, [#allocation6], %s3840_s30, %s3840_s30, %s3842_s16  }
  0x17   :  { %s2914_s23 = scalar_lea.hbm %s3827_s3, 64 }
  0x18   :  { %p2915_p8 = scmp.ne.s32.totalorder %s3827_s3, %s2914_s23  ;;  %p2918_p9 = scmp.lt.u32.totalorder %s2914_s23, %s3827_s3 }
  0x1a   :  { %p2920_p10 = pnand %p2918_p9, %p2915_p8 }
  0x1c   :  { %2923 = shalt.err (!%p2920_p10)
}
  0x1d   :  { %s2924_s28 = scalar_lea.vmem %s3207_s21, 64  ;;  %p2929_p12 = scmp.lt.s32.totalorder %s3207_s21, %s3207_s21 }
  0x1e   :  { %p2925_p11 = scmp.ne.s32.totalorder %s3207_s21, %s2924_s28  ;;  %p2930_p13 = scmp.lt.s32.totalorder %s2924_s28, %s2924_s28 }
  0x20   :  { %p2931_p0 = por %p2930_p13, %p2929_p12 }
  0x22   :  { %p2932_p1 = pnand %p2931_p0, %p2925_p11 }
  0x24   :  { %2935 = shalt.err (!%p2932_p1)
}
  0x25   :  { %s3106_s1 = smov 32   ;;  %s3107_s19 = smov 2  }
  0x26   :  { %74 = dma.hbm_to_vmem [thread:$0]  %s3827_s3, 64, %s3207_s21, [#allocation9], %s3106_s1, %s3106_s1, %s3107_s19  }
  0x27   :  { %s3108_s18 = smov [#allocation11]   ;;  %s3109_s22 = smov [#allocation2]  }
  0x28   :  { %s98_s20 = sshll.u32 %s3108_s18, 4  ;;  %s32_s23 = sshll.u32 %s3109_s22, 4  ;;  %s99_s20 = int_to_ptr.vmem [resolvable:$true] %s98_s20  ;;  %s3241_s23 = int_to_ptr.vmem [resolvable:$true] %s32_s23 }
  0x29   :  { %s2936_s26 = scalar_lea.hbm %s3832_s8, 256 }
  0x2a   :  { %p2937_p2 = scmp.ne.s32.totalorder %s3832_s8, %s2936_s26  ;;  %p2940_p3 = scmp.lt.u32.totalorder %s2936_s26, %s3832_s8 }
  0x2c   :  { %p2942_p4 = pnand %p2940_p3, %p2937_p2 }
  0x2e   :  { %2945 = shalt.err (!%p2942_p4)
}
  0x2f   :  { %s2946_s3 = scalar_lea.vmem %s99_s20, 256  ;;  %p2951_p6 = scmp.lt.s32.totalorder %s99_s20, %s99_s20 }
  0x30   :  { %p2947_p5 = scmp.ne.s32.totalorder %s99_s20, %s2946_s3  ;;  %p2952_p7 = scmp.lt.s32.totalorder %s2946_s3, %s2946_s3 }
  0x32   :  { %p2953_p8 = por %p2952_p7, %p2951_p6 }
  0x34   :  { %p2954_p9 = pnand %p2953_p8, %p2947_p5 }
  0x36   :  { %2957 = shalt.err (!%p2954_p9)
}
  0x37   :  { %s3110_s21 = smov 64   ;;  %s3111_s1 = smov 4  }
  0x38   :  { %104 = dma.hbm_to_vmem [thread:$0]  %s3832_s8, 256, %s99_s20, [#allocation12], %s3110_s21, %s3110_s21, %s3111_s1  }
  0x39   :  { %s2958_s17 = scalar_lea.hbm %s3824_s0, 256 }
  0x3a   :  { %p2959_p10 = scmp.ne.s32.totalorder %s3824_s0, %s2958_s17  ;;  %p2962_p11 = scmp.lt.u32.totalorder %s2958_s17, %s3824_s0 }
  0x3c   :  { %p2964_p12 = pnand %p2962_p11, %p2959_p10 }
  0x3e   :  { %2967 = shalt.err (!%p2964_p12)
}
  0x3f   :  { %s2968_s26 = scalar_lea.vmem %s3241_s23, 256  ;;  %p2973_p0 = scmp.lt.s32.totalorder %s3241_s23, %s3241_s23 }
  0x40   :  { %p2969_p13 = scmp.ne.s32.totalorder %s3241_s23, %s2968_s26  ;;  %p2974_p1 = scmp.lt.s32.totalorder %s2968_s26, %s2968_s26 }
  0x42   :  { %p2975_p2 = por %p2974_p1, %p2973_p0 }
  0x44   :  { %p2976_p3 = pnand %p2975_p2, %p2969_p13 }
  0x46   :  { %2979 = shalt.err (!%p2976_p3)
}
  0x47   :  { %s3844_s8 = smov 8   ;;  %s3845_s20 = smov 128  }
  0x48   :  { %38 = dma.hbm_to_vmem [thread:$0]  %s3824_s0, 256, %s3241_s23, [#allocation3], %s3845_s20, %s3845_s20, %s3844_s8  }
  0x49   :  { %s3112_s3 = smov [#allocation7]   ;;  %s3113_s29 = smov [#allocation10]  }
  0x4a   :  { %s56_s19 = sshll.u32 %s3112_s3, 4  ;;  %s80_s30 = sshll.u32 %s3113_s29, 4  ;;  %s57_s19 = int_to_ptr.vmem [resolvable:$true] %s56_s19  ;;  %s3278_s30 = int_to_ptr.vmem [resolvable:$true] %s80_s30 }
  0x4b   :  { %s2980_s18 = scalar_lea.hbm %s3826_s2, 256 }
  0x4c   :  { %p2981_p4 = scmp.ne.s32.totalorder %s3826_s2, %s2980_s18  ;;  %p2984_p5 = scmp.lt.u32.totalorder %s2980_s18, %s3826_s2 }
  0x4e   :  { %p2986_p6 = pnand %p2984_p5, %p2981_p4 }
  0x50   :  { %2989 = shalt.err (!%p2986_p6)
}
  0x51   :  { %s2990_s0 = scalar_lea.vmem %s57_s19, 256  ;;  %p2995_p8 = scmp.lt.s32.totalorder %s57_s19, %s57_s19 }
  0x52   :  { %p2991_p7 = scmp.ne.s32.totalorder %s57_s19, %s2990_s0  ;;  %p2996_p9 = scmp.lt.s32.totalorder %s2990_s0, %s2990_s0 }
  0x54   :  { %p2997_p10 = por %p2996_p9, %p2995_p8 }
  0x56   :  { %p2998_p11 = pnand %p2997_p10, %p2991_p7 }
  0x58   :  { %3001 = shalt.err (!%p2998_p11)
}
  0x59   :  { %62 = dma.hbm_to_vmem [thread:$0]  %s3826_s2, 256, %s57_s19, [#allocation6], %s3845_s20, %s3845_s20, %s3844_s8  }
  0x5a   :  { %s3002_s29 = scalar_lea.hbm %s3828_s4, 256 }
  0x5b   :  { %p3003_p12 = scmp.ne.s32.totalorder %s3828_s4, %s3002_s29  ;;  %p3006_p13 = scmp.lt.u32.totalorder %s3002_s29, %s3828_s4 }
  0x5d   :  { %p3008_p0 = pnand %p3006_p13, %p3003_p12 }
  0x5f   :  { %3011 = shalt.err (!%p3008_p0)
}
  0x60   :  { %s3012_s24 = scalar_lea.vmem %s3278_s30, 256  ;;  %p3017_p2 = scmp.lt.s32.totalorder %s3278_s30, %s3278_s30 }
  0x61   :  { %p3013_p1 = scmp.ne.s32.totalorder %s3278_s30, %s3012_s24  ;;  %p3018_p3 = scmp.lt.s32.totalorder %s3012_s24, %s3012_s24 }
  0x63   :  { %p3019_p4 = por %p3018_p3, %p3017_p2 }
  0x65   :  { %p3020_p5 = pnand %p3019_p4, %p3013_p1 }
  0x67   :  { %3023 = shalt.err (!%p3020_p5)
}
  0x68   :  { %86 = dma.hbm_to_vmem [thread:$0]  %s3828_s4, 256, %s3278_s30, [#allocation9], %s3110_s21, %s3110_s21, %s3111_s1  }
  0x69   :  { %s3114_s25 = smov [#allocation13]   ;;  %s3024_s27 = scalar_lea.hbm %s3833_s9, 16 }
  0x6a   :  { %s111_s26 = sshll.u32 %s3114_s25, 4  ;;  %p3025_p6 = scmp.ne.s32.totalorder %s3833_s9, %s3024_s27  ;;  %s112_s26 = int_to_ptr.vmem [resolvable:$true] %s111_s26 }
  0x6b   :  { %p3028_p7 = scmp.lt.u32.totalorder %s3024_s27, %s3833_s9 }
  0x6d   :  { %p3030_p8 = pnand %p3028_p7, %p3025_p6 }
  0x6f   :  { %3033 = shalt.err (!%p3030_p8)
}
  0x70   :  { %s3034_s17 = scalar_lea.vmem %s112_s26, 16  ;;  %s3038_s4 = scalar_lea.vmem %s112_s26, 32 }
  0x71   :  { %p3035_p9 = scmp.ne.s32.totalorder %s112_s26, %s3034_s17  ;;  %p3039_p10 = scmp.lt.s32.totalorder %s112_s26, %s112_s26 }
  0x72   :  { %p3040_p11 = scmp.lt.s32.totalorder %s3038_s4, %s3034_s17 }
  0x74   :  { %p3041_p12 = por %p3040_p11, %p3039_p10 }
  0x76   :  { %p3042_p13 = pnand %p3041_p12, %p3035_p9 }
  0x78   :  { %3045 = shalt.err (!%p3042_p13)
}
  0x79   :  { %114 = dma.hbm_to_vmem [thread:$0]  %s3833_s9, 16, %s112_s26, [#allocation12]  }
  0x7a   :  { %3090 = dma.done.wait [#allocation3], 256  }
  0x7b   :  { %3091 = vsyncadd [#allocation3], 4294967040 }
  0x7c   :  { %3092 = dma.done.wait [#allocation6], 512  }
  0x7d   :  { %3093 = vsyncadd [#allocation6], 4294966784 }
  0x7e   :  { %3094 = dma.done.wait [#allocation9], 320  }
  0x7f   :  { %3095 = vsyncadd [#allocation9], 4294966976 }
  0x80   :  { %3096 = dma.done.wait [#allocation12], 272  }
  0x81   :  { %3097 = vsyncadd [#allocation12], 4294967024  ;;  %v3115_v0 = vmov 0.0   ;;  %vm3116_vm0 = vmmov 0   ;;  %v2846_v1 = vld [vmem:[%s3830_s6] sm:$0xff]   ;;  %v2847_v2 = vld [vmem:[#allocation10] sm:$0xff]   ;;  %v385_v34 = vlaneseq }
  0x82   :  { %2686 = vmatprep.subr.bf16.mxu1 %v3115_v0  ;;  %2678 = vmatprep.subr.bf16.mxu0 %v3115_v0  ;;  %v2848_v3 = vld [vmem:[%s3830_s6 + $0x8] sm:$0xff]   ;;  %v2849_v4 = vld [vmem:[#allocation10 + $0x8] sm:$0xff]   ;;  %v149_v5 = vld [vmem:[#allocation5] sm:$0xff]  ;;  %vm177_vm1 = vcmask 261120   ;;  %s3117_s25 = smov 104   ;;  %s3118_s26 = smov 120  }
  0x83   :  { %2690 = vmatprep.mubr.msk.bf16.mxu1 %vm3116_vm0, %v3115_v0  ;;  %2682 = vmatprep.mubr.msk.bf16.mxu0 %vm3116_vm0, %v3115_v0  ;;  %v150_v6 = vld [vmem:[#allocation5 + $0x8] sm:$0xff]  ;;  %v147_v7 = vld [vmem:[#allocation2] sm:$0xff]  ;;  %v148_v9 = vld [vmem:[#allocation2 + $0x8] sm:$0xff]  ;;  %v3120_v32 = vmov 1983009808   ;;  %v386_v40 = vshrl.u32 %v385_v34, 7 }
  0x84   :  { %2687 = vmatpush3.bf16.msra.mxu1 %v2846_v1  ;;  %2679 = vmatpush3.bf16.msra.mxu0 %v2847_v2  ;;  %v222_v8 = vpack.c.bf16 %v150_v6, %v149_v5  ;;  %v153_v10 = vpack.c.bf16 %v148_v9, %v147_v7  ;;  %v2850_v11 = vld [vmem:[#allocation11] sm:$0xff]   ;;  %v2851_v12 = vld [vmem:[#allocation11 + $0x8] sm:$0xff]   ;;  %v2588_v16 = vld [vmem:[%s3831_s7] ss:$0 sm:$0xff]  ;;  %s3119_s7 = smov 112   ;;  %v383_v33 = vunpack.c.l.s4 %v3120_v32  ;;  %vm1260_vm2 = vcmask 64512  }
  0x85   :  { %2688 = vmatprep.subr.bf16.mxu1 %v3115_v0  ;;  %2680 = vmatprep.subr.bf16.mxu0 %v3115_v0  ;;  %v151_v13 = vld [vmem:[#allocation7] sm:$0xff]  ;;  %v152_v14 = vld [vmem:[#allocation7 + $0x8] sm:$0xff]  ;;  %v2592_v35 = vld [vmem:[#allocation13] ss:$0 sm:$0xff]  ;;  %v3121_v36 = vmov 1934713408  }
  0x86   :  { %v290_v15 = vpack.c.bf16 %v152_v14, %v151_v13  ;;  %v2584_v17 = vld [vmem:[%s3829_s5] ss:$0 sm:$0xff]  ;;  %v415_v37 = vunpack.c.l.s4 %v3121_v36  ;;  %v384_v39 = vunpack.c.0.s8 %v383_v33  ;;  %vm1758_vm7 = vcmask 1043456   ;;  %s3123_s28 = smov 16   ;;  %s3124_s3 = smov 24  }
  0x87   :  { %vm2422_vm8 = vcmask 130048   ;;  %vm2425_vm9 = vcmask 195584  }
  0x88   :  { %2689 = vmatpush3.bf16.msra.mxu1 %v2848_v3  ;;  %2681 = vmatpush3.bf16.msra.mxu0 %v2849_v4  ;;  %v416_v46 = vunpack.c.0.s8 %v415_v37  ;;  %v3388_v49 = vsub.s32 %v384_v39, %v386_v40 }
  0x89   :  { %2702 = vmatprep.subr.bf16.mxu1 %v3115_v0  ;;  %2694 = vmatprep.subr.bf16.mxu0 %v3115_v0 }
  0x8a   :  { %v3390_v56 = vsub.s32 %v416_v46, %v386_v40 }
  0x8b   :  { %2691 = vmatmul.mubr.msk.bf16.vlgmr.msra.gmra.mrb[0].mxu1 %vm177_vm1, %v222_v8  ;;  %2683 = vmatmul.mubr.msk.bf16.vlgmr.msra.gmra.mrb[0].mxu0 %vm177_vm1, %v153_v10 }
  0x8c   :  { %2704 = vmatprep.mubr.msk.bf16.mxu1 %vm3116_vm0, %v3115_v0  ;;  %2698 = vmatprep.mubr.msk.bf16.mxu0 %vm3116_vm0, %v3115_v0 }
  0x8d   :  { %2695 = vmatpush3.bf16.msra.mxu0 %v2850_v11 }
  0x8e   :  { %2696 = vmatprep.subr.bf16.mxu0 %v3115_v0 }
  0x91   :  { %2697 = vmatpush3.bf16.msra.mxu0 %v2851_v12 }
  0x92   :  { %2708 = vmatprep.subr.bf16.mxu0 %v3115_v0 }
  0x94   :  { %2699 = vmatmul.mubr.msk.bf16.vlgmr.msra.gmra.mrb[4].mxu0 %vm177_vm1, %v290_v15 }
  0x95   :  { %2710 = vmatprep.mubr.msk.bf16.mxu0 %vm3116_vm0, %v3115_v0 }
 0x15e   :  { %v283_v18 = vpop.f32.mrb[0].mxu1  ;;  %v215_v21 = vpop.f32.mrb[0].mxu0 }
 0x15f   :  { %v284_v19 = vadd.f32 %v2588_v16, %v283_v18  ;;  %v2692_v20 = vpop.f32.mrb[1].mxu1  ;;  %v216_v22 = vadd.f32 %v2584_v17, %v215_v21  ;;  %v2684_v24 = vpop.f32.mrb[1].mxu0 }
 0x160   :  { %v286_v23 = vpop.f32.mrb[2].mxu1  ;;  %v218_v26 = vpop.f32.mrb[2].mxu0 }
 0x161   :  { %674 = vrot.lane.b32.xlu1 %v284_v19, %s3117_s25  ;;  %662 = vrot.lane.b32.xlu0 %v284_v19, %s3118_s26  ;;  %v2693_v25 = vpop.f32.mrb[3].mxu1  ;;  %v358_v27 = vmul.f32 0.35355338, %v216_v22  ;;  %v2685_v28 = vpop.f32.mrb[3].mxu0  ;;  %v3366_v29 = vadd.f32 %v2588_v16, %v286_v23  ;;  %v219_v30 = vadd.f32 %v2584_v17, %v218_v26 }
 0x163   :  { %v3372_v31 = vmul.f32 0.35355338, %v219_v30 }
 0x165   :  { %668 = vrot.lane.b32.xlu0 %v284_v19, %s3119_s7  ;;  %362 = vrot.lane.b32.xlu1 %v358_v27, %s3118_s26 }
 0x167   :  { %v351_v38 = vpop.f32.mrb[4].mxu0 }
 0x168   :  { %v3382_v41 = vadd.f32 %v2592_v35, %v351_v38  ;;  %v2700_v42 = vpop.f32.mrb[5].mxu0 }
 0x169   :  { %368 = vrot.lane.b32.xlu0 %v358_v27, %s3119_s7  ;;  %374 = vrot.lane.b32.xlu1 %v358_v27, %s3117_s25  ;;  %v354_v45 = vpop.f32.mrb[6].mxu0 }
 0x16a   :  { %v3386_v47 = vadd.f32 %v2592_v35, %v354_v45  ;;  %v2701_v48 = vpop.f32.mrb[7].mxu0 }
 0x16d   :  { %664 = vrot.lane.b32.xlu0 %v3366_v29, %s3118_s26  ;;  %670 = vrot.lane.b32.xlu1 %v3366_v29, %s3119_s7 }
 0x171   :  { %676 = vrot.lane.b32.xlu0 %v3366_v29, %s3117_s25  ;;  %364 = vrot.lane.b32.xlu1 %v3372_v31, %s3118_s26 }
 0x175   :  { %370 = vrot.lane.b32.xlu0 %v3372_v31, %s3119_s7  ;;  %376 = vrot.lane.b32.xlu1 %v3372_v31, %s3117_s25 }
 0x179   :  { %962 = vrot.lane.b32.xlu1 %v3382_v41, %s3118_s26 }
 0x1d3   :  { %v675_v43 = vpop.permute.xlu1 %674  ;;  %v663_v44 = vpop.permute.xlu0 %662 }
 0x1d4   :  { %v696_v50 = vcombine.low %v663_v44, %v675_v43  ;;  %v697_v51 = vcombine.high %v663_v44, %v675_v43 }
 0x1d6   :  { %v704_v57 = vrot.slane %v696_v50, %v3388_v49  ;;  %v711_v58 = vrot.slane %v697_v51, %v3388_v49 }
 0x1d7   :  { %v669_v52 = vpop.permute.xlu0 %668  ;;  %v363_v53 = vpop.permute.xlu1 %362 }
 0x1d8   :  { %v680_v54 = vcombine.low %v284_v19, %v669_v52  ;;  %v681_v55 = vcombine.high %v284_v19, %v669_v52 }
 0x1da   :  { %v688_v59 = vrot.slane %v680_v54, %v3388_v49  ;;  %v695_v60 = vrot.slane %v681_v55, %v3388_v49 }
 0x1db   :  { %v369_v61 = vpop.permute.xlu0 %368  ;;  %v375_v62 = vpop.permute.xlu1 %374 }
 0x1dc   :  { %v712_v63 = vcombine.low %v688_v59, %v704_v57  ;;  %v713_v1 = vcombine.high %v688_v59, %v704_v57  ;;  %v728_v2 = vcombine.low %v695_v60, %v711_v58  ;;  %v729_v3 = vcombine.high %v695_v60, %v711_v58 }
 0x1dd   :  { %v380_v4 = vcombine.low %v358_v27, %v369_v61  ;;  %v381_v5 = vcombine.high %v358_v27, %v369_v61  ;;  %v396_v6 = vcombine.low %v363_v53, %v375_v62  ;;  %v397_v7 = vcombine.high %v363_v53, %v375_v62 }
 0x1de   :  { %v720_v8 = vrot.slane %v712_v63, %v3390_v56  ;;  %v727_v9 = vrot.slane %v713_v1, %v3390_v56  ;;  %v736_v10 = vrot.slane %v728_v2, %v3390_v56  ;;  %v743_v11 = vrot.slane %v729_v3, %v3390_v56 }
 0x1df   :  { %v388_v12 = vrot.slane %v380_v4, %v3388_v49  ;;  %v395_v13 = vrot.slane %v381_v5, %v3388_v49  ;;  %v404_v14 = vrot.slane %v396_v6, %v3388_v49  ;;  %v411_v15 = vrot.slane %v397_v7, %v3388_v49  ;;  %v665_v16 = vpop.permute.xlu0 %664  ;;  %v671_v17 = vpop.permute.xlu1 %670 }
 0x1e0   :  { %v816_v22 = vcombine.low %v720_v8, %v727_v9  ;;  %v2600_v23 = vcombine.high %v720_v8, %v727_v9  ;;  %v832_v24 = vcombine.low %v736_v10, %v743_v11  ;;  %v2601_v25 = vcombine.high %v736_v10, %v743_v11 }
 0x1e1   :  { %v412_v18 = vcombine.low %v388_v12, %v404_v14  ;;  %v413_v19 = vcombine.high %v388_v12, %v404_v14  ;;  %v428_v20 = vcombine.low %v395_v13, %v411_v15  ;;  %v429_v21 = vcombine.high %v395_v13, %v411_v15 }
 0x1e2   :  { %v748_v34 = vcombine.low %v3366_v29, %v671_v17  ;;  %v749_v35 = vcombine.high %v3366_v29, %v671_v17  ;;  %v823_v54 = vrot.slane %v816_v22, %v3388_v49  ;;  %v831_v55 = vrot.slane %v2600_v23, %v3388_v49 }
 0x1e3   :  { %v420_v26 = vrot.slane %v412_v18, %v3390_v56  ;;  %v427_v27 = vrot.slane %v413_v19, %v3390_v56  ;;  %v436_v28 = vrot.slane %v428_v20, %v3390_v56  ;;  %v443_v30 = vrot.slane %v429_v21, %v3390_v56  ;;  %v677_v32 = vpop.permute.xlu0 %676  ;;  %v365_v33 = vpop.permute.xlu1 %364 }
 0x1e4   :  { %v764_v36 = vcombine.low %v665_v16, %v677_v32  ;;  %v765_v37 = vcombine.high %v665_v16, %v677_v32  ;;  %v756_v43 = vrot.slane %v748_v34, %v3388_v49  ;;  %v763_v44 = vrot.slane %v749_v35, %v3388_v49 }
 0x1e5   :  { %v516_v38 = vcombine.low %v420_v26, %v427_v27  ;;  %v2596_v39 = vcombine.high %v420_v26, %v427_v27  ;;  %v532_v40 = vcombine.low %v436_v28, %v443_v30  ;;  %v2597_v42 = vcombine.high %v436_v28, %v443_v30 }
 0x1e6   :  { %v772_v45 = vrot.slane %v764_v36, %v3388_v49  ;;  %v779_v46 = vrot.slane %v765_v37, %v3388_v49  ;;  %v839_v57 = vrot.slane %v832_v24, %v3388_v49  ;;  %v847_v58 = vrot.slane %v2601_v25, %v3388_v49 }
 0x1e7   :  { %v371_v53 = vpop.permute.xlu0 %370  ;;  %v377_v29 = vpop.permute.xlu1 %376  ;;  %v3419_v59 = vrot.slane %v516_v38, %v3388_v49  ;;  %v3422_v60 = vrot.slane %v2596_v39, %v3388_v49  ;;  %v3425_v61 = vrot.slane %v532_v40, %v3388_v49  ;;  %v3428_v62 = vrot.slane %v2597_v42, %v3388_v49 }
 0x1e8   :  { %v780_v48 = vcombine.low %v756_v43, %v772_v45  ;;  %v781_v50 = vcombine.high %v756_v43, %v772_v45  ;;  %v796_v51 = vcombine.low %v763_v44, %v779_v46  ;;  %v797_v52 = vcombine.high %v763_v44, %v779_v46 }
 0x1e9   :  { %v448_v63 = vcombine.low %v3372_v31, %v371_v53  ;;  %v449_v1 = vcombine.high %v3372_v31, %v371_v53  ;;  %v464_v2 = vcombine.low %v365_v33, %v377_v29  ;;  %v465_v3 = vcombine.high %v365_v33, %v377_v29 }
 0x1ea   :  { %v788_v4 = vrot.slane %v780_v48, %v3390_v56  ;;  %v795_v5 = vrot.slane %v781_v50, %v3390_v56  ;;  %v804_v6 = vrot.slane %v796_v51, %v3390_v56  ;;  %v811_v7 = vrot.slane %v797_v52, %v3390_v56 }
 0x1eb   :  { %v456_v8 = vrot.slane %v448_v63, %v3388_v49  ;;  %v463_v9 = vrot.slane %v449_v1, %v3388_v49  ;;  %v472_v10 = vrot.slane %v464_v2, %v3388_v49  ;;  %v479_v11 = vrot.slane %v465_v3, %v3388_v49 }
 0x1ec   :  { %v548_v31 = vcombine.low %v3419_v59, %v3422_v60  ;;  %v564_v12 = vcombine.low %v3425_v61, %v3428_v62  ;;  %v884_v15 = vcombine.low %v788_v4, %v795_v5  ;;  %v2602_v16 = vcombine.high %v788_v4, %v795_v5 }
 0x1ed   :  { %v480_v13 = vcombine.low %v456_v8, %v472_v10  ;;  %v481_v14 = vcombine.high %v456_v8, %v472_v10  ;;  %v848_v17 = vcombine.low %v823_v54, %v831_v55  ;;  %v864_v18 = vcombine.low %v839_v57, %v847_v58 }
 0x1ee   :  { %v900_v19 = vcombine.low %v804_v6, %v811_v7  ;;  %v2603_v20 = vcombine.high %v804_v6, %v811_v7  ;;  %v496_v21 = vcombine.low %v463_v9, %v479_v11  ;;  %v497_v22 = vcombine.high %v463_v9, %v479_v11 }
 0x1ef   :  { %v549_v23 = vcombine.high %v3419_v59, %v3422_v60  ;;  %v565_v24 = vcombine.high %v3425_v61, %v3428_v62  ;;  %v856_v25 = vrot.slane %v848_v17, %v3390_v56  ;;  %v872_v26 = vrot.slane %v864_v18, %v3390_v56 }
 0x1f0   :  { %v488_v27 = vrot.slane %v480_v13, %v3390_v56  ;;  %v495_v28 = vrot.slane %v481_v14, %v3390_v56  ;;  %v556_v30 = vrot.slane %v548_v31, %v3390_v56  ;;  %v572_v32 = vrot.slane %v564_v12, %v3390_v56 }
 0x1f1   :  { %v3455_v33 = vrot.slane %v884_v15, %v3388_v49  ;;  %v899_v34 = vrot.slane %v2602_v16, %v3388_v49  ;;  %v880_v35 = vcombine.low %v856_v25, %v872_v26  ;;  %v881_v36 = vcombine.high %v856_v25, %v872_v26 }
 0x1f2   :  { %v907_v37 = vrot.slane %v900_v19, %v3388_v49  ;;  %v915_v38 = vrot.slane %v2603_v20, %v3388_v49  ;;  %v504_v39 = vrot.slane %v496_v21, %v3390_v56  ;;  %v511_v40 = vrot.slane %v497_v22, %v3390_v56 }
 0x1f3   :  { %v952_v42 = vpack.c.bf16 %v880_v35, %v880_v35  ;;  %v953_v43 = vpack.c.bf16 %v881_v36, %v881_v36  ;;  %v849_v44 = vcombine.high %v823_v54, %v831_v55  ;;  %v865_v45 = vcombine.high %v839_v57, %v847_v58 }
 0x1f4   :  { %v584_v46 = vcombine.low %v488_v27, %v495_v28  ;;  %v2598_v48 = vcombine.high %v488_v27, %v495_v28  ;;  %v580_v50 = vcombine.low %v556_v30, %v572_v32  ;;  %v581_v51 = vcombine.high %v556_v30, %v572_v32 }
 0x1f5   :  { %v1265_v52 = vsel %vm1260_vm2, %v952_v42, 0  ;;  %v1311_v53 = vsel %vm1260_vm2, %v953_v43, 0  ;;  %v863_v29 = vrot.slane %v849_v44, %v3390_v56  ;;  %v879_v59 = vrot.slane %v865_v45, %v3390_v56 }
 0x1f6   :  { %v600_v60 = vcombine.low %v504_v39, %v511_v40  ;;  %v2599_v61 = vcombine.high %v504_v39, %v511_v40  ;;  %2703 = vmatpush3.bf16.xpose.msra.mxu1 %v1265_v52  ;;  %2709 = vmatpush3.bf16.xpose.msra.mxu0 %v1311_v53  ;;  %v916_v62 = vcombine.low %v3455_v33, %v899_v34  ;;  %v1629_v53 = vld [vmem:[#allocation8] sm:$0x3] }
 0x1f7   :  { %2714 = vmatprep.subr.bf16.mxu1 %v3115_v0  ;;  %2720 = vmatprep.subr.bf16.mxu0 %v3115_v0  ;;  %v882_v54 = vcombine.low %v863_v29, %v879_v59  ;;  %v883_v55 = vcombine.high %v863_v29, %v879_v59  ;;  %v932_v57 = vcombine.low %v907_v37, %v915_v38  ;;  %v3122_v29 = vmov 0  }
 0x1f8   :  { %v924_v1 = vrot.slane %v916_v62, %v3390_v56  ;;  %v591_v3 = vrot.slane %v584_v46, %v3388_v49  ;;  %v599_v4 = vrot.slane %v2598_v48, %v3388_v49  ;;  %v652_v5 = vpack.c.bf16 %v580_v50, %v580_v50 }
 0x1f9   :  { %v954_v58 = vpack.c.bf16 %v882_v54, %v882_v54  ;;  %v955_v63 = vpack.c.bf16 %v883_v55, %v883_v55  ;;  %v940_v2 = vrot.slane %v932_v57, %v3390_v56  ;;  %v653_v6 = vpack.c.bf16 %v581_v51, %v581_v51  ;;  %v1630_v55 = vld [vmem:[#allocation8 + $0x2] sm:$0x3] }
 0x1fa   :  { %v607_v7 = vrot.slane %v600_v60, %v3388_v49  ;;  %v615_v8 = vrot.slane %v2599_v61, %v3388_v49  ;;  %v563_v9 = vrot.slane %v549_v23, %v3390_v56  ;;  %v579_v10 = vrot.slane %v565_v24, %v3390_v56 }
 0x1fb   :  { %v917_v11 = vcombine.high %v3455_v33, %v899_v34  ;;  %v933_v31 = vcombine.high %v907_v37, %v915_v38  ;;  %v1357_v12 = vsel %vm1260_vm2, %v954_v58, 0  ;;  %v1403_v13 = vsel %vm1260_vm2, %v955_v63, 0 }
 0x1fc   :  { %v948_v14 = vcombine.low %v924_v1, %v940_v2  ;;  %v949_v15 = vcombine.high %v924_v1, %v940_v2  ;;  %v616_v16 = vcombine.low %v591_v3, %v599_v4  ;;  %v632_v17 = vcombine.low %v607_v7, %v615_v8 }
 0x1fd   :  { %2705 = vmatmul.mubr.msk.bf16.vlgmr.msra.gmra.mrb[4].mxu1 %vm1260_vm2, %v652_v5  ;;  %2711 = vmatmul.mubr.msk.bf16.vlgmr.msra.gmra.mrb[8].mxu0 %vm1260_vm2, %v653_v6  ;;  %v582_v18 = vcombine.low %v563_v9, %v579_v10  ;;  %v583_v19 = vcombine.high %v563_v9, %v579_v10  ;;  %v931_v22 = vrot.slane %v917_v11, %v3390_v56 }
 0x1fe   :  { %2715 = vmatpush3.bf16.xpose.msra.mxu1 %v1357_v12  ;;  %2721 = vmatpush3.bf16.xpose.msra.mxu0 %v1403_v13  ;;  %v956_v20 = vpack.c.bf16 %v948_v14, %v948_v14  ;;  %v957_v21 = vpack.c.bf16 %v949_v15, %v949_v15  ;;  %v947_v23 = vrot.slane %v933_v31, %v3390_v56 }
 0x1ff   :  { %2716 = vmatprep.mubr.msk.bf16.mxu1 %vm3116_vm0, %v3115_v0  ;;  %2722 = vmatprep.mubr.msk.bf16.mxu0 %vm3116_vm0, %v3115_v0  ;;  %v654_v24 = vpack.c.bf16 %v582_v18, %v582_v18  ;;  %v655_v25 = vpack.c.bf16 %v583_v19, %v583_v19  ;;  %v624_v26 = vrot.slane %v616_v16, %v3390_v56 }
 0x200   :  { %2726 = vmatprep.subr.bf16.mxu1 %v3115_v0  ;;  %2732 = vmatprep.subr.bf16.mxu0 %v3115_v0  ;;  %v640_v27 = vrot.slane %v632_v17, %v3390_v56  ;;  %v1449_v28 = vsel %vm1260_vm2, %v956_v20, 0  ;;  %v1495_v30 = vsel %vm1260_vm2, %v957_v21, 0  ;;  %v950_v32 = vcombine.low %v931_v22, %v947_v23 }
 0x201   :  { %v951_v33 = vcombine.high %v931_v22, %v947_v23  ;;  %v617_v34 = vcombine.high %v591_v3, %v599_v4  ;;  %v633_v35 = vcombine.high %v607_v7, %v615_v8  ;;  %vm1631_vm3 = vnez %v1629_v53 }
 0x202   :  { %v648_v36 = vcombine.low %v624_v26, %v640_v27  ;;  %v649_v37 = vcombine.high %v624_v26, %v640_v27  ;;  %v958_v38 = vpack.c.bf16 %v950_v32, %v950_v32  ;;  %v1633_v59 = vsel %vm1631_vm3, 16843009, %v3122_v29 }
 0x203   :  { %v959_v39 = vpack.c.bf16 %v951_v33, %v951_v33  ;;  %v631_v43 = vrot.slane %v617_v34, %v3390_v56  ;;  %v647_v44 = vrot.slane %v633_v35, %v3390_v56  ;;  %v1635_v60 = vunpack.c.0.s8 %v1633_v59 }
 0x204   :  { %v656_v40 = vpack.c.bf16 %v648_v36, %v648_v36  ;;  %v657_v42 = vpack.c.bf16 %v649_v37, %v649_v37  ;;  %v1541_v45 = vsel %vm1260_vm2, %v958_v38, 0  ;;  %vm1632_vm5 = vnez %v1630_v55 }
 0x205   :  { %2717 = vmatmul.mubr.msk.bf16.vlgmr.msra.gmra.mrb[8].mxu1 %vm1260_vm2, %v654_v24  ;;  %2723 = vmatmul.mubr.msk.bf16.vlgmr.msra.gmra.mrb[12].mxu0 %vm1260_vm2, %v655_v25  ;;  %v1587_v46 = vsel %vm1260_vm2, %v959_v39, 0  ;;  %v650_v48 = vcombine.low %v631_v43, %v647_v44  ;;  %v651_v50 = vcombine.high %v631_v43, %v647_v44  ;;  %vm3520_vm4 = vcmp.ne.s32.totalorder %v1635_v60, 0 }
 0x206   :  { %2727 = vmatpush3.bf16.xpose.msra.mxu1 %v1449_v28  ;;  %2733 = vmatpush3.bf16.xpose.msra.mxu0 %v1495_v30  ;;  %v1634_v8 = vsel %vm1632_vm5, 16843009, %v3122_v29 }
 0x207   :  { %2728 = vmatprep.mubr.msk.bf16.mxu1 %vm3116_vm0, %v3115_v0  ;;  %2734 = vmatprep.mubr.msk.bf16.mxu0 %vm3116_vm0, %v3115_v0  ;;  %v658_v51 = vpack.c.bf16 %v650_v48, %v650_v48  ;;  %v659_v52 = vpack.c.bf16 %v651_v50, %v651_v50  ;;  %v1636_v16 = vunpack.c.0.s8 %v1634_v8 }
 0x208   :  { %2738 = vmatprep.subr.bf16.mxu1 %v3115_v0  ;;  %2744 = vmatprep.subr.bf16.mxu0 %v3115_v0 }
 0x209   :  { %vm3542_vm6 = vcmp.ne.s32.totalorder %v1636_v16, 0 }
 0x20d   :  { %2729 = vmatmul.mubr.msk.bf16.vlgmr.msra.gmra.mrb[12].mxu1 %vm1260_vm2, %v656_v40  ;;  %2735 = vmatmul.mubr.msk.bf16.vlgmr.msra.gmra.mrb[16].mxu0 %vm1260_vm2, %v657_v42 }
 0x20e   :  { %2739 = vmatpush3.bf16.xpose.msra.mxu1 %v1541_v45  ;;  %2745 = vmatpush3.bf16.xpose.msra.mxu0 %v1587_v46 }
 0x20f   :  { %2740 = vmatprep.mubr.msk.bf16.mxu1 %vm3116_vm0, %v3115_v0  ;;  %2746 = vmatprep.mubr.msk.bf16.mxu0 %vm3116_vm0, %v3115_v0 }
 0x210   :  { %2750 = vmatprep.subr.bf16.mxu1 %v3115_v0  ;;  %2756 = vmatprep.subr.bf16.mxu0 %v3115_v0 }
 0x215   :  { %2741 = vmatmul.mubr.msk.bf16.vlgmr.msra.gmra.mrb[16].mxu1 %vm1260_vm2, %v658_v51  ;;  %2747 = vmatmul.mubr.msk.bf16.vlgmr.msra.gmra.mrb[20].mxu0 %vm1260_vm2, %v659_v52  ;;  %v963_v51 = vpop.permute.xlu1 %962 }
 0x216   :  { %2752 = vmatprep.mubr.msk.bf16.mxu1 %vm3116_vm0, %v3115_v0  ;;  %2758 = vmatprep.mubr.msk.bf16.mxu0 %vm3116_vm0, %v3115_v0 }
 0x2d0   :  { %v1301_v62 = vpop.f32.mrb[4].mxu1  ;;  %v1347_v54 = vpop.f32.mrb[8].mxu0 }
 0x2d1   :  { %v3526_v57 = vsel %vm3520_vm4, -1e+30, %v1301_v62  ;;  %v3530_v58 = vsel %vm3520_vm4, -1e+30, %v1347_v54  ;;  %v2706_v63 = vpop.f32.mrb[5].mxu1  ;;  %v2712_v1 = vpop.f32.mrb[9].mxu0 }
 0x2d2   :  { %v1304_v2 = vpop.f32.mrb[6].mxu1  ;;  %v1350_v3 = vpop.f32.mrb[10].mxu0  ;;  %v1651_v4 = vsel %vm1260_vm2, %v3526_v57, -inf  ;;  %v1654_v5 = vsel %vm1260_vm2, %v3530_v58, -inf }
 0x2d3   :  { %v2707_v6 = vpop.f32.mrb[7].mxu1  ;;  %1652 = vmax.xlane.f32.xlu0 %v1651_v4  ;;  %1655 = vmax.xlane.f32.xlu1 %v1654_v5  ;;  %v2713_v7 = vpop.f32.mrb[11].mxu0 }
 0x2d8   :  { %v1393_v9 = vpop.f32.mrb[8].mxu1  ;;  %v1439_v10 = vpop.f32.mrb[12].mxu0 }
 0x2d9   :  { %v1645_v11 = vsel %vm3520_vm4, -1e+30, %v1393_v9  ;;  %v2718_v31 = vpop.f32.mrb[9].mxu1  ;;  %v2724_v12 = vpop.f32.mrb[13].mxu0  ;;  %v1646_v17 = vsel %vm3520_vm4, -1e+30, %v1439_v10 }
 0x2da   :  { %v1396_v13 = vpop.f32.mrb[10].mxu1  ;;  %v1442_v14 = vpop.f32.mrb[14].mxu0  ;;  %v1657_v15 = vsel %vm1260_vm2, %v1645_v11, -inf  ;;  %v1660_v20 = vsel %vm1260_vm2, %v1646_v17, -inf }
 0x2db   :  { %v2719_v18 = vpop.f32.mrb[11].mxu1  ;;  %1658 = vmax.xlane.f32.xlu0 %v1657_v15  ;;  %v2725_v19 = vpop.f32.mrb[15].mxu0 }
 0x2df   :  { %1661 = vmax.xlane.f32.xlu0 %v1660_v20 }
 0x2e0   :  { %v1485_v22 = vpop.f32.mrb[12].mxu1  ;;  %v1531_v23 = vpop.f32.mrb[16].mxu0 }
 0x2e1   :  { %v1647_v24 = vsel %vm3542_vm6, -1e+30, %v1485_v22  ;;  %v3550_v25 = vsel %vm3542_vm6, -1e+30, %v1531_v23  ;;  %v2730_v26 = vpop.f32.mrb[13].mxu1  ;;  %v2736_v27 = vpop.f32.mrb[17].mxu0 }
 0x2e2   :  { %v1488_v28 = vpop.f32.mrb[14].mxu1  ;;  %v1534_v30 = vpop.f32.mrb[18].mxu0  ;;  %v1663_v32 = vsel %vm1260_vm2, %v1647_v24, -inf  ;;  %v1666_v33 = vsel %vm1260_vm2, %v3550_v25, -inf }
 0x2e3   :  { %v2731_v34 = vpop.f32.mrb[15].mxu1  ;;  %1664 = vmax.xlane.f32.xlu1 %v1663_v32  ;;  %1667 = vmax.xlane.f32.xlu0 %v1666_v33  ;;  %v2737_v35 = vpop.f32.mrb[19].mxu0 }
 0x2e8   :  { %v1577_v36 = vpop.f32.mrb[16].mxu1  ;;  %v1623_v37 = vpop.f32.mrb[20].mxu0 }
 0x2e9   :  { %v3557_v38 = vsel %vm3542_vm6, -1e+30, %v1577_v36  ;;  %v3561_v39 = vsel %vm3542_vm6, -1e+30, %v1623_v37  ;;  %v2742_v40 = vpop.f32.mrb[17].mxu1  ;;  %v2748_v42 = vpop.f32.mrb[21].mxu0 }
 0x2ea   :  { %v1580_v43 = vpop.f32.mrb[18].mxu1  ;;  %v1626_v44 = vpop.f32.mrb[22].mxu0  ;;  %v1669_v45 = vsel %vm1260_vm2, %v3557_v38, -inf  ;;  %v1672_v46 = vsel %vm1260_vm2, %v3561_v39, -inf }
 0x2eb   :  { %v2743_v48 = vpop.f32.mrb[19].mxu1  ;;  %1670 = vmax.xlane.f32.xlu1 %v1669_v45  ;;  %1673 = vmax.xlane.f32.xlu0 %v1672_v46  ;;  %v2749_v50 = vpop.f32.mrb[23].mxu0 }
 0x2fc   :  { %974 = vrot.lane.b32.xlu1 %v3382_v41, %s3117_s25 }
 0x301   :  { %968 = vrot.lane.b32.xlu0 %v3382_v41, %s3119_s7 }
 0x360   :  { %v1653_v52 = vpop.xlane.xlu0 %1652  ;;  %v1656_v53 = vpop.xlane.xlu1 %1655 }
 0x361   :  { %v1675_v29 = vsub.f32 %v3526_v57, %v1653_v52  ;;  %v1676_v59 = vsub.f32 %v3530_v58, %v1656_v53 }
 0x363   :  { %v1683_v60 = vmul.f32 1.442695, %v1675_v29  ;;  %v1685_v61 = vmul.f32 1.442695, %v1676_v59 }
 0x365   :  { %2854 = vpow2.f32 %v1683_v60 }
 0x366   :  { %2856 = vpow2.f32 %v1685_v61 }
 0x368   :  { %v1659_v62 = vpop.xlane.xlu0 %1658 }
 0x369   :  { %v1677_v54 = vsub.f32 %v1645_v11, %v1659_v62 }
 0x36b   :  { %v1687_v55 = vmul.f32 1.442695, %v1677_v54 }
 0x36c   :  { %v1662_v63 = vpop.xlane.xlu0 %1661 }
 0x36d   :  { %2858 = vpow2.f32 %v1687_v55  ;;  %v1678_v1 = vsub.f32 %v1646_v17, %v1662_v63 }
 0x36f   :  { %v3573_v2 = vpop.eup %2854  ;;  %v1689_v3 = vmul.f32 1.442695, %v1678_v1 }
 0x370   :  { %v3575_v4 = vpop.eup %2856  ;;  %v1665_v5 = vpop.xlane.xlu1 %1664  ;;  %v1699_v57 = vsel %vm1260_vm2, %v3573_v2, 0.0 }
 0x371   :  { %2860 = vpow2.f32 %v1689_v3  ;;  %v1679_v58 = vsub.f32 %v1647_v24, %v1665_v5  ;;  %1700 = vadd.xlane.f32.xlu1 %v1699_v57  ;;  %v1702_v6 = vsel %vm1260_vm2, %v3575_v4, 0.0  ;;  %v3581_v8 = vpop.xlane.xlu0 %1667 }
 0x372   :  { %1703 = vadd.xlane.f32.xlu0 %v1702_v6  ;;  %v1680_v57 = vsub.f32 %v3550_v25, %v3581_v8 }
 0x373   :  { %v1691_v7 = vmul.f32 1.442695, %v1679_v58 }
 0x374   :  { %v1693_v58 = vmul.f32 1.442695, %v1680_v57 }
 0x375   :  { %2862 = vpow2.f32 %v1691_v7 }
 0x376   :  { %2864 = vpow2.f32 %v1693_v58 }
 0x377   :  { %v3583_v9 = vpop.eup %2858 }
 0x378   :  { %v3585_v10 = vpop.xlane.xlu1 %1670  ;;  %v3587_v11 = vpop.xlane.xlu0 %1673  ;;  %v1705_v31 = vsel %vm1260_vm2, %v3583_v9, 0.0 }
 0x379   :  { %1706 = vadd.xlane.f32.xlu1 %v1705_v31  ;;  %v1681_v6 = vsub.f32 %v3557_v38, %v3585_v10  ;;  %v1682_v25 = vsub.f32 %v3561_v39, %v3587_v11 }
 0x37b   :  { %v3591_v12 = vpop.eup %2860  ;;  %v1695_v7 = vmul.f32 1.442695, %v1681_v6  ;;  %v1697_v38 = vmul.f32 1.442695, %v1682_v25 }
 0x37c   :  { %v975_v13 = vpop.permute.xlu1 %974  ;;  %v969_v14 = vpop.permute.xlu0 %968  ;;  %v1708_v15 = vsel %vm1260_vm2, %v3591_v12, 0.0 }
 0x37d   :  { %v996_v16 = vcombine.low %v963_v51, %v975_v13  ;;  %v997_v17 = vcombine.high %v963_v51, %v975_v13  ;;  %v980_v18 = vcombine.low %v3382_v41, %v969_v14  ;;  %1709 = vadd.xlane.f32.xlu0 %v1708_v15  ;;  %v981_v19 = vcombine.high %v3382_v41, %v969_v14 }
 0x37e   :  { %2866 = vpow2.f32 %v1695_v7 }
 0x37f   :  { %v3597_v20 = vpop.eup %2862  ;;  %v1004_v21 = vrot.slane %v996_v16, %v3388_v49  ;;  %v1011_v22 = vrot.slane %v997_v17, %v3388_v49  ;;  %v988_v23 = vrot.slane %v980_v18, %v3388_v49  ;;  %v995_v24 = vrot.slane %v981_v19, %v3388_v49 }
 0x380   :  { %v1711_v26 = vsel %vm1260_vm2, %v3597_v20, 0.0  ;;  %v3629_v31 = vpop.eup %2864  ;;  %2868 = vpow2.f32 %v1697_v38 }
 0x381   :  { %v1012_v27 = vcombine.low %v988_v23, %v1004_v21  ;;  %v1013_v28 = vcombine.high %v988_v23, %v1004_v21  ;;  %1712 = vadd.xlane.f32.xlu0 %v1711_v26  ;;  %v1028_v30 = vcombine.low %v995_v24, %v1011_v22  ;;  %v1029_v32 = vcombine.high %v995_v24, %v1011_v22 }
 0x382   :  { %v1714_v13 = vsel %vm1260_vm2, %v3629_v31, 0.0 }
 0x383   :  { %v1020_v41 = vrot.slane %v1012_v27, %v3390_v56  ;;  %v1027_v33 = vrot.slane %v1013_v28, %v3390_v56  ;;  %v1036_v34 = vrot.slane %v1028_v30, %v3390_v56  ;;  %v1043_v35 = vrot.slane %v1029_v32, %v3390_v56 }
 0x385   :  { %v1116_v36 = vcombine.low %v1020_v41, %v1027_v33  ;;  %v2604_v37 = vcombine.high %v1020_v41, %v1027_v33  ;;  %v1132_v40 = vcombine.low %v1036_v34, %v1043_v35  ;;  %v2605_v42 = vcombine.high %v1036_v34, %v1043_v35 }
 0x387   :  { %v1123_v43 = vrot.slane %v1116_v36, %v3388_v49  ;;  %v1131_v44 = vrot.slane %v2604_v37, %v3388_v49  ;;  %v1139_v45 = vrot.slane %v1132_v40, %v3388_v49  ;;  %v1147_v46 = vrot.slane %v2605_v42, %v3388_v49 }
 0x388   :  { %v3633_v14 = vpop.eup %2866 }
 0x389   :  { %v1148_v48 = vcombine.low %v1123_v43, %v1131_v44  ;;  %v1149_v50 = vcombine.high %v1123_v43, %v1131_v44  ;;  %v1164_v51 = vcombine.low %v1139_v45, %v1147_v46  ;;  %v1165_v52 = vcombine.high %v1139_v45, %v1147_v46 }
 0x38a   :  { %970 = vrot.lane.b32.xlu1 %v3386_v47, %s3119_s7  ;;  %v1717_v15 = vsel %vm1260_vm2, %v3633_v14, 0.0  ;;  %v3641_v8 = vpop.eup %2868 }
 0x38b   :  { %v1156_v53 = vrot.slane %v1148_v48, %v3390_v56  ;;  %v1163_v29 = vrot.slane %v1149_v50, %v3390_v56  ;;  %v1172_v59 = vrot.slane %v1164_v51, %v3390_v56  ;;  %v1179_v60 = vrot.slane %v1165_v52, %v3390_v56 }
 0x38c   :  { %v1720_v10 = vsel %vm1260_vm2, %v3641_v8, 0.0 }
 0x38d   :  { %v1180_v61 = vcombine.low %v1156_v53, %v1172_v59  ;;  %v1181_v62 = vcombine.high %v1156_v53, %v1172_v59  ;;  %v1182_v54 = vcombine.low %v1163_v29, %v1179_v60  ;;  %v1183_v55 = vcombine.high %v1163_v29, %v1179_v60 }
 0x38f   :  { %v1252_v63 = vpack.c.bf16 %v1180_v61, %v1180_v61  ;;  %v1253_v1 = vpack.c.bf16 %v1181_v62, %v1181_v62  ;;  %v1254_v39 = vpack.c.bf16 %v1182_v54, %v1182_v54  ;;  %v1255_v24 = vpack.c.bf16 %v1183_v55, %v1183_v55 }
 0x391   :  { %v1760_v3 = vsel %vm1758_vm7, %v1252_v63, 0  ;;  %v1806_v5 = vsel %vm1758_vm7, %v1253_v1, 0  ;;  %v1852_v28 = vsel %vm1758_vm7, %v1254_v39, 0 }
 0x392   :  { %2751 = vmatpush3.bf16.msra.mxu1 %v1760_v3  ;;  %2757 = vmatpush3.bf16.msra.mxu0 %v1806_v5 }
 0x393   :  { %2762 = vmatprep.subr.bf16.mxu1 %v3115_v0  ;;  %2768 = vmatprep.subr.bf16.mxu0 %v3115_v0 }
 0x397   :  { %964 = vrot.lane.b32.xlu0 %v3386_v47, %s3118_s26 }
 0x3ae   :  { %1715 = vadd.xlane.f32.xlu1 %v1714_v13 }
 0x3b6   :  { %1718 = vadd.xlane.f32.xlu0 %v1717_v15 }
 0x3bf   :  { %976 = vrot.lane.b32.xlu1 %v3386_v47, %s3117_s25 }
 0x3e3   :  { %1721 = vadd.xlane.f32.xlu1 %v1720_v10 }
 0x3fe   :  { %v1701_v16 = vpop.xlane.xlu1 %1700 }
 0x3ff   :  { %2870 = vrcp.f32 %v1701_v16  ;;  %v1704_v17 = vpop.xlane.xlu0 %1703 }
 0x400   :  { %2872 = vrcp.f32 %v1704_v17 }
 0x406   :  { %v1707_v18 = vpop.xlane.xlu1 %1706 }
 0x407   :  { %2874 = vrcp.f32 %v1707_v18 }
 0x409   :  { %v2871_v19 = vpop.eup %2870 }
 0x40a   :  { %v2873_v21 = vpop.eup %2872  ;;  %v1731_v22 = vmul.f32 %v2871_v19, %v3573_v2  ;;  %v1710_v23 = vpop.xlane.xlu0 %1709  ;;  %v1898_v2 = vsel %vm1758_vm7, %v1255_v24, 0 }
 0x40b   :  { %v1732_v11 = vmul.f32 %v2873_v21, %v3575_v4  ;;  %2876 = vrcp.f32 %v1710_v23 }
 0x40c   :  { %1739 = vst.msk [vmem:[#allocation15] sm:$0xff] %vm1260_vm2, %v1731_v22  ;;  %v1747_v26 = vpack.c.bf16 %v1731_v22, %v1731_v22 }
 0x40d   :  { %1741 = vst.msk [vmem:[#allocation15 + $0x10] sm:$0xff] %vm1260_vm2, %v1732_v11  ;;  %v1748_v27 = vpack.c.bf16 %v1732_v11, %v1732_v11 }
 0x40e   :  { %2753 = vmatmul.mubr.msk.bf16.vlgmr.msra.gmra.mrb[20].mxu1 %vm1260_vm2, %v1747_v26  ;;  %v1713_v30 = vpop.xlane.xlu0 %1712 }
 0x40f   :  { %2759 = vmatmul.mubr.msk.bf16.vlgmr.msra.gmra.mrb[24].mxu0 %vm1260_vm2, %v1748_v27  ;;  %2763 = vmatpush3.bf16.msra.mxu1 %v1852_v28  ;;  %2878 = vrcp.f32 %v1713_v30 }
 0x410   :  { %2769 = vmatpush3.bf16.msra.mxu0 %v1898_v2  ;;  %2764 = vmatprep.mubr.msk.bf16.mxu1 %vm3116_vm0, %v3115_v0 }
 0x411   :  { %v2875_v4 = vpop.eup %2874  ;;  %2770 = vmatprep.mubr.msk.bf16.mxu0 %vm3116_vm0, %v3115_v0  ;;  %2774 = vmatprep.subr.bf16.mxu1 %v3115_v0 }
 0x412   :  { %v1733_v32 = vmul.f32 %v2875_v4, %v3583_v9  ;;  %2780 = vmatprep.subr.bf16.mxu0 %v3115_v0  ;;  %v971_v9 = vpop.permute.xlu1 %970  ;;  %v965_v43 = vpop.permute.xlu0 %964 }
 0x413   :  { %v1048_v40 = vcombine.low %v3386_v47, %v971_v9  ;;  %v1049_v42 = vcombine.high %v3386_v47, %v971_v9 }
 0x414   :  { %1743 = vst.msk [vmem:[#allocation15 + $0x20] sm:$0xff] %vm1260_vm2, %v1733_v32  ;;  %v1749_v41 = vpack.c.bf16 %v1733_v32, %v1733_v32 }
 0x415   :  { %v2877_v33 = vpop.eup %2876  ;;  %v1056_v46 = vrot.slane %v1048_v40, %v3388_v49  ;;  %v1063_v48 = vrot.slane %v1049_v42, %v3388_v49 }
 0x416   :  { %v1734_v34 = vmul.f32 %v2877_v33, %v3591_v12  ;;  %2765 = vmatmul.mubr.msk.bf16.vlgmr.msra.gmra.mrb[24].mxu1 %vm1260_vm2, %v1749_v41 }
 0x417   :  { %2776 = vmatprep.mubr.msk.bf16.mxu1 %vm3116_vm0, %v3115_v0 }
 0x418   :  { %1745 = vst.msk [vmem:[#allocation15 + $0x30] sm:$0xff] %vm1260_vm2, %v1734_v34  ;;  %v1750_v35 = vpack.c.bf16 %v1734_v34, %v1734_v34 }
 0x419   :  { %v2879_v36 = vpop.eup %2878 }
 0x41a   :  { %v3667_v37 = vmul.f32 %v2879_v36, %v3597_v20  ;;  %2771 = vmatmul.mubr.msk.bf16.vlgmr.msra.gmra.mrb[28].mxu0 %vm1260_vm2, %v1750_v35 }
 0x41b   :  { %2782 = vmatprep.mubr.msk.bf16.mxu0 %vm3116_vm0, %v3115_v0 }
 0x41c   :  { %1740 = vst.msk [vmem:[#allocation15 + $0x8] sm:$0xff] %vm1260_vm2, %v3667_v37  ;;  %v1751_v4 = vpack.c.bf16 %v3667_v37, %v3667_v37 }
 0x43b   :  { %v1716_v12 = vpop.xlane.xlu1 %1715 }
 0x43c   :  { %2880 = vrcp.f32 %v1716_v12 }
 0x43f   :  { %v977_v44 = vpop.permute.xlu1 %976 }
 0x440   :  { %v1064_v45 = vcombine.low %v965_v43, %v977_v44  ;;  %v1065_v20 = vcombine.high %v965_v43, %v977_v44 }
 0x442   :  { %v1072_v50 = vrot.slane %v1064_v45, %v3388_v49  ;;  %v1079_v51 = vrot.slane %v1065_v20, %v3388_v49 }
 0x443   :  { %v1719_v52 = vpop.xlane.xlu0 %1718 }
 0x444   :  { %v1080_v53 = vcombine.low %v1056_v46, %v1072_v50  ;;  %v1081_v29 = vcombine.high %v1056_v46, %v1072_v50  ;;  %v1096_v59 = vcombine.low %v1063_v48, %v1079_v51  ;;  %v1097_v60 = vcombine.high %v1063_v48, %v1079_v51 }
 0x445   :  { %2882 = vrcp.f32 %v1719_v52 }
 0x446   :  { %v2881_v61 = vpop.eup %2880  ;;  %v1088_v47 = vrot.slane %v1080_v53, %v3390_v56  ;;  %v1095_v62 = vrot.slane %v1081_v29, %v3390_v56  ;;  %v1104_v54 = vrot.slane %v1096_v59, %v3390_v56  ;;  %v1111_v55 = vrot.slane %v1097_v60, %v3390_v56 }
 0x447   :  { %v1736_v63 = vmul.f32 %v2881_v61, %v3629_v31 }
 0x448   :  { %v1184_v1 = vcombine.low %v1088_v47, %v1095_v62  ;;  %v2606_v3 = vcombine.high %v1088_v47, %v1095_v62  ;;  %v1200_v5 = vcombine.low %v1104_v54, %v1111_v55  ;;  %v2607_v57 = vcombine.high %v1104_v54, %v1111_v55 }
 0x449   :  { %1742 = vst.msk [vmem:[#allocation15 + $0x18] sm:$0xff] %vm1260_vm2, %v1736_v63 }
 0x44a   :  { %v1191_v58 = vrot.slane %v1184_v1, %v3388_v49  ;;  %v1199_v6 = vrot.slane %v2606_v3, %v3388_v49  ;;  %v1207_v7 = vrot.slane %v1200_v5, %v3388_v49  ;;  %v1215_v13 = vrot.slane %v2607_v57, %v3388_v49 }
 0x44c   :  { %v1216_v15 = vcombine.low %v1191_v58, %v1199_v6  ;;  %v1232_v25 = vcombine.low %v1207_v7, %v1215_v13  ;;  %v1217_v38 = vcombine.high %v1191_v58, %v1199_v6  ;;  %v1233_v10 = vcombine.high %v1207_v7, %v1215_v13 }
 0x44e   :  { %v1224_v31 = vrot.slane %v1216_v15, %v3390_v56  ;;  %v1240_v16 = vrot.slane %v1232_v25, %v3390_v56  ;;  %v1231_v17 = vrot.slane %v1217_v38, %v3390_v56  ;;  %v1247_v18 = vrot.slane %v1233_v10, %v3390_v56 }
 0x44f   :  { %v2883_v19 = vpop.eup %2882 }
 0x450   :  { %v1737_v21 = vmul.f32 %v2883_v19, %v3633_v14  ;;  %v1248_v22 = vcombine.low %v1224_v31, %v1240_v16  ;;  %v1249_v23 = vcombine.high %v1224_v31, %v1240_v16  ;;  %v1250_v39 = vcombine.low %v1231_v17, %v1247_v18 }
 0x451   :  { %v1251_v11 = vcombine.high %v1231_v17, %v1247_v18  ;;  %v1752_v14 = vpack.c.bf16 %v1736_v63, %v1736_v63 }
 0x452   :  { %1744 = vst.msk [vmem:[#allocation15 + $0x28] sm:$0xff] %vm1260_vm2, %v1737_v21  ;;  %v1256_v24 = vpack.c.bf16 %v1248_v22, %v1248_v22  ;;  %v1257_v26 = vpack.c.bf16 %v1249_v23, %v1249_v23  ;;  %v1258_v30 = vpack.c.bf16 %v1250_v39, %v1250_v39  ;;  %v1753_v33 = vpack.c.bf16 %v1737_v21, %v1737_v21 }
 0x453   :  { %v1259_v2 = vpack.c.bf16 %v1251_v11, %v1251_v11 }
 0x454   :  { %v1944_v27 = vsel %vm1758_vm7, %v1256_v24, 0  ;;  %v1990_v28 = vsel %vm1758_vm7, %v1257_v26, 0  ;;  %v2036_v32 = vsel %vm1758_vm7, %v1258_v30, 0 }
 0x455   :  { %2775 = vmatpush3.bf16.msra.mxu1 %v1944_v27  ;;  %2781 = vmatpush3.bf16.msra.mxu0 %v1990_v28  ;;  %v2082_v41 = vsel %vm1758_vm7, %v1259_v2, 0 }
 0x456   :  { %2786 = vmatprep.subr.bf16.mxu1 %v3115_v0  ;;  %2792 = vmatprep.subr.bf16.mxu0 %v3115_v0 }
 0x458   :  { %2777 = vmatmul.mubr.msk.bf16.vlgmr.msra.gmra.mrb[28].mxu1 %vm1260_vm2, %v1751_v4  ;;  %2783 = vmatmul.mubr.msk.bf16.vlgmr.msra.gmra.mrb[32].mxu0 %vm1260_vm2, %v1752_v14 }
 0x459   :  { %2787 = vmatpush3.bf16.msra.mxu1 %v2036_v32  ;;  %2793 = vmatpush3.bf16.msra.mxu0 %v2082_v41 }
 0x45a   :  { %2788 = vmatprep.mubr.msk.bf16.mxu1 %vm3116_vm0, %v3115_v0  ;;  %2794 = vmatprep.mubr.msk.bf16.mxu0 %vm3116_vm0, %v3115_v0 }
 0x45b   :  { %2798 = vmatprep.subr.bf16.mxu1 %v3115_v0 }
 0x460   :  { %2789 = vmatmul.mubr.msk.bf16.vlgmr.msra.gmra.mrb[32].mxu1 %vm1260_vm2, %v1753_v33 }
 0x461   :  { %2802 = vmatprep.mubr.msk.bf16.mxu1 %vm3116_vm0, %v3115_v0 }
 0x470   :  { %v1722_v34 = vpop.xlane.xlu1 %1721 }
 0x471   :  { %2884 = vrcp.f32 %v1722_v34 }
 0x47b   :  { %v2885_v35 = vpop.eup %2884 }
 0x47c   :  { %v1738_v36 = vmul.f32 %v2885_v35, %v3641_v8 }
 0x47e   :  { %1746 = vst.msk [vmem:[#allocation15 + $0x38] sm:$0xff] %vm1260_vm2, %v1738_v36  ;;  %v1754_v37 = vpack.c.bf16 %v1738_v36, %v1738_v36 }
 0x480   :  { %2795 = vmatmul.mubr.msk.bf16.vlgmr.msra.gmra.mrb[36].mxu0 %vm1260_vm2, %v1754_v37 }
 0x4e1   :  { %v1796_v9 = vpop.f32.mrb[20].mxu1 }
 0x4e2   :  { %v1842_v12 = vpop.f32.mrb[24].mxu0  ;;  %v2754_v40 = vpop.f32.mrb[21].mxu1 }
 0x4e3   :  { %v2760_v42 = vpop.f32.mrb[25].mxu0  ;;  %v1799_v43 = vpop.f32.mrb[22].mxu1 }
 0x4e4   :  { %v1845_v44 = vpop.f32.mrb[26].mxu0  ;;  %v2755_v45 = vpop.f32.mrb[23].mxu1 }
 0x4e5   :  { %v2761_v20 = vpop.f32.mrb[27].mxu0 }
 0x4e9   :  { %v1888_v46 = vpop.f32.mrb[24].mxu1 }
 0x4ea   :  { %v2124_v48 = vcombine.low %v1796_v9, %v1888_v46  ;;  %v2125_v50 = vcombine.high %v1796_v9, %v1888_v46  ;;  %v2766_v51 = vpop.f32.mrb[25].mxu1 }
 0x4eb   :  { %v1891_v52 = vpop.f32.mrb[26].mxu1 }
 0x4ec   :  { %v2767_v53 = vpop.f32.mrb[27].mxu1  ;;  %v2132_v47 = vrot.slane %v2124_v48, %v3388_v49  ;;  %v2139_v62 = vrot.slane %v2125_v50, %v3388_v49 }
 0x4ed   :  { %v1934_v8 = vpop.f32.mrb[28].mxu0 }
 0x4ee   :  { %v2140_v29 = vcombine.low %v1842_v12, %v1934_v8  ;;  %v2141_v59 = vcombine.high %v1842_v12, %v1934_v8  ;;  %v2772_v60 = vpop.f32.mrb[29].mxu0 }
 0x4ef   :  { %v1937_v61 = vpop.f32.mrb[30].mxu0 }
 0x4f0   :  { %v2148_v54 = vrot.slane %v2140_v29, %v3388_v49  ;;  %v2155_v55 = vrot.slane %v2141_v59, %v3388_v49  ;;  %v2773_v63 = vpop.f32.mrb[31].mxu0 }
 0x4f2   :  { %v2156_v1 = vcombine.low %v2132_v47, %v2148_v54  ;;  %v2157_v3 = vcombine.high %v2132_v47, %v2148_v54  ;;  %v2172_v5 = vcombine.low %v2139_v62, %v2155_v55  ;;  %v2173_v57 = vcombine.high %v2139_v62, %v2155_v55 }
 0x4f4   :  { %v2164_v58 = vrot.slane %v2156_v1, %v3390_v56  ;;  %v2171_v6 = vrot.slane %v2157_v3, %v3390_v56  ;;  %v2180_v7 = vrot.slane %v2172_v5, %v3390_v56  ;;  %v2187_v13 = vrot.slane %v2173_v57, %v3390_v56  ;;  %v2852_v57 = vld [vmem:[%s3834_s10] sm:$0xff]  }
 0x4f5   :  { %2799 = vmatpush3.bf16.msra.mxu1 %v2852_v57 }
 0x4f6   :  { %v2260_v15 = vcombine.low %v2164_v58, %v2171_v6  ;;  %v2624_v25 = vcombine.high %v2164_v58, %v2171_v6  ;;  %v2276_v38 = vcombine.low %v2180_v7, %v2187_v13  ;;  %v2625_v10 = vcombine.high %v2180_v7, %v2187_v13  ;;  %2800 = vmatprep.subr.bf16.mxu1 %v3115_v0 }
 0x4f8   :  { %v2267_v31 = vrot.slane %v2260_v15, %v3388_v49  ;;  %v2275_v16 = vrot.slane %v2624_v25, %v3388_v49  ;;  %v2283_v17 = vrot.slane %v2276_v38, %v3388_v49  ;;  %v2291_v18 = vrot.slane %v2625_v10, %v3388_v49 }
 0x4fa   :  { %v2293_v19 = vcombine.high %v2267_v31, %v2275_v16  ;;  %v2309_v21 = vcombine.high %v2283_v17, %v2291_v18  ;;  %v2292_v22 = vcombine.low %v2267_v31, %v2275_v16  ;;  %v2308_v23 = vcombine.low %v2283_v17, %v2291_v18 }
 0x4fc   :  { %v3730_v39 = vrot.slane %v2293_v19, %v3390_v56  ;;  %v3733_v11 = vrot.slane %v2309_v21, %v3390_v56  ;;  %v3736_v24 = vrot.slane %v2292_v22, %v3390_v56  ;;  %v3739_v26 = vrot.slane %v2308_v23, %v3390_v56  ;;  %v2853_v19 = vld [vmem:[%s3834_s10 + $0x8] sm:$0xff]  }
 0x4fd   :  { %2801 = vmatpush3.bf16.msra.mxu1 %v2853_v19 }
 0x4fe   :  { %v2326_v27 = vcombine.low %v3730_v39, %v3733_v11  ;;  %v2324_v28 = vcombine.low %v3736_v24, %v3739_v26  ;;  %v2325_v30 = vcombine.high %v3736_v24, %v3739_v26  ;;  %v2327_v2 = vcombine.high %v3730_v39, %v3733_v11  ;;  %v2628_v24 = vld [vmem:[%s3835_s11] ss:$0 sm:$0xff]  ;;  %s3125_s11 = smov [#allocation15]  }
 0x4ff   :  { %s2565_s16 = sshll.u32 %s3125_s11, 4  ;;  %s2566_s16 = int_to_ptr.vmem [resolvable:$true] %s2565_s16 }
 0x500   :  { %s3046_s17 = scalar_lea.vmem %s2566_s16, 1024  ;;  %p3051_p1 = scmp.lt.s32.totalorder %s2566_s16, %s2566_s16 }
 0x501   :  { %p3047_p0 = scmp.ne.s32.totalorder %s2566_s16, %s3046_s17  ;;  %p3052_p2 = scmp.lt.s32.totalorder %s3046_s17, %s3046_s17 }
 0x503   :  { %p3053_p3 = por %p3052_p2, %p3051_p1 }
 0x505   :  { %p3054_p4 = pnand %p3053_p3, %p3047_p0 }
 0x52b   :  { %v1980_v4 = vpop.f32.mrb[28].mxu1  ;;  %v2026_v14 = vpop.f32.mrb[32].mxu0 }
 0x52c   :  { %v2778_v32 = vpop.f32.mrb[29].mxu1  ;;  %v2784_v41 = vpop.f32.mrb[33].mxu0 }
 0x52d   :  { %v1983_v33 = vpop.f32.mrb[30].mxu1  ;;  %v2029_v34 = vpop.f32.mrb[34].mxu0 }
 0x52e   :  { %v2779_v35 = vpop.f32.mrb[31].mxu1  ;;  %v2785_v36 = vpop.f32.mrb[35].mxu0 }
 0x533   :  { %v2072_v37 = vpop.f32.mrb[32].mxu1 }
 0x534   :  { %v2192_v9 = vcombine.low %v1980_v4, %v2072_v37  ;;  %v2193_v12 = vcombine.high %v1980_v4, %v2072_v37  ;;  %v2790_v40 = vpop.f32.mrb[33].mxu1 }
 0x535   :  { %v2075_v42 = vpop.f32.mrb[34].mxu1 }
 0x536   :  { %v2791_v43 = vpop.f32.mrb[35].mxu1  ;;  %v2200_v50 = vrot.slane %v2192_v9, %v3388_v49  ;;  %v2207_v51 = vrot.slane %v2193_v12, %v3388_v49 }
 0x553   :  { %v2118_v44 = vpop.f32.mrb[36].mxu0 }
 0x554   :  { %v2208_v45 = vcombine.low %v2026_v14, %v2118_v44  ;;  %v2209_v20 = vcombine.high %v2026_v14, %v2118_v44  ;;  %v2796_v46 = vpop.f32.mrb[37].mxu0  ;;  %v2890_v44 = vld [vmem:[#allocation2] sm:$0xff] }
 0x555   :  { %v2121_v48 = vpop.f32.mrb[38].mxu0 }
 0x556   :  { %v2216_v52 = vrot.slane %v2208_v45, %v3388_v49  ;;  %v2223_v53 = vrot.slane %v2209_v20, %v3388_v49  ;;  %v2797_v8 = vpop.f32.mrb[39].mxu0  ;;  %v2891_v48 = vld [vmem:[#allocation2 + $0x8] sm:$0xff] }
 0x558   :  { %v2224_v29 = vcombine.low %v2200_v50, %v2216_v52  ;;  %v2225_v59 = vcombine.high %v2200_v50, %v2216_v52  ;;  %v2240_v60 = vcombine.low %v2207_v51, %v2223_v53  ;;  %v2241_v61 = vcombine.high %v2207_v51, %v2223_v53 }
 0x55a   :  { %v2232_v47 = vrot.slane %v2224_v29, %v3390_v56  ;;  %v2239_v62 = vrot.slane %v2225_v59, %v3390_v56  ;;  %v2248_v54 = vrot.slane %v2240_v60, %v3390_v56  ;;  %v2255_v55 = vrot.slane %v2241_v61, %v3390_v56 }
 0x55c   :  { %v2328_v63 = vcombine.low %v2232_v47, %v2239_v62  ;;  %v2626_v1 = vcombine.high %v2232_v47, %v2239_v62  ;;  %v2344_v3 = vcombine.low %v2248_v54, %v2255_v55  ;;  %v2627_v5 = vcombine.high %v2248_v54, %v2255_v55 }
 0x55e   :  { %v2335_v58 = vrot.slane %v2328_v63, %v3388_v49  ;;  %v2343_v6 = vrot.slane %v2626_v1, %v3388_v49  ;;  %v2351_v7 = vrot.slane %v2344_v3, %v3388_v49  ;;  %v2359_v13 = vrot.slane %v2627_v5, %v3388_v49 }
 0x560   :  { %v2361_v15 = vcombine.high %v2335_v58, %v2343_v6  ;;  %v2377_v25 = vcombine.high %v2351_v7, %v2359_v13  ;;  %v2360_v38 = vcombine.low %v2335_v58, %v2343_v6  ;;  %v2376_v10 = vcombine.low %v2351_v7, %v2359_v13 }
 0x562   :  { %v2375_v31 = vrot.slane %v2361_v15, %v3390_v56  ;;  %v2391_v16 = vrot.slane %v2377_v25, %v3390_v56  ;;  %v2368_v17 = vrot.slane %v2360_v38, %v3390_v56  ;;  %v2384_v18 = vrot.slane %v2376_v10, %v3390_v56 }
 0x564   :  { %v2394_v49 = vcombine.low %v2375_v31, %v2391_v16  ;;  %v2393_v21 = vcombine.high %v2368_v17, %v2384_v18  ;;  %v2392_v22 = vcombine.low %v2368_v17, %v2384_v18  ;;  %v2395_v23 = vcombine.high %v2375_v31, %v2391_v16 }
 0x566   :  { %v2836_v39 = vpack.i.bf16 %v2394_v49, %v2326_v27  ;;  %v2831_v11 = vpack.i.bf16 %v2393_v21, %v2325_v30  ;;  %v2841_v0 = vpack.i.bf16 %v2395_v23, %v2327_v2 }
 0x568   :  { %2837 = vrot.lane.b32.xlu1 %v2836_v39, %s3123_s28  ;;  %2832 = vrot.lane.b32.xlu0 %v2831_v11, %s3844_s8 }
 0x56c   :  { %2842 = vrot.lane.b32.xlu0 %v2841_v0, %s3124_s3 }
 0x5da   :  { %v2838_v4 = vpop.permute.xlu1 %2837  ;;  %v2833_v56 = vpop.permute.xlu0 %2832 }
 0x5db   :  { %v2835_v14 = vunpack.i.h.bf16 %v2833_v56  ;;  %v2834_v32 = vunpack.i.l.bf16 %v2833_v56  ;;  %v2840_v41 = vunpack.i.h.bf16 %v2838_v4  ;;  %v2839_v33 = vunpack.i.l.bf16 %v2838_v4 }
 0x5dd   :  { %v2420_v34 = vsel %vm1260_vm2, %v2324_v28, %v2834_v32  ;;  %v2421_v27 = vsel %vm1260_vm2, %v2392_v22, %v2835_v14 }
 0x5de   :  { %v2843_v30 = vpop.permute.xlu0 %2842  ;;  %v2423_v36 = vsel %vm2422_vm8, %v2420_v34, %v2839_v33  ;;  %v2424_v37 = vsel %vm2422_vm8, %v2421_v27, %v2840_v41 }
 0x5df   :  { %v2845_v2 = vunpack.i.h.bf16 %v2843_v30  ;;  %v2844_v35 = vunpack.i.l.bf16 %v2843_v30 }
 0x5e1   :  { %v2426_v9 = vsel %vm2425_vm9, %v2423_v36, %v2844_v35  ;;  %v2427_v12 = vsel %vm2425_vm9, %v2424_v37, %v2845_v2 }
 0x5e2   :  { %v2428_v40 = vpack.c.bf16 %v2427_v12, %v2426_v9 }
 0x5e4   :  { %2803 = vmatmul.mubr.msk.bf16.vlgmr.msra.gmra.mrb[36].mxu1 %vm177_vm1, %v2428_v40 }
 0x6b7   :  { %v2489_v26 = vpop.f32.mrb[36].mxu1 }
 0x6b8   :  { %v2490_v28 = vadd.f32 %v2628_v24, %v2489_v26  ;;  %v2804_v42 = vpop.f32.mrb[37].mxu1 }
 0x6b9   :  { %v2492_v43 = vpop.f32.mrb[38].mxu1 }
 0x6ba   :  { %v2496_v45 = vadd.f32 %v2890_v44, %v2490_v28  ;;  %v2493_v20 = vadd.f32 %v2628_v24, %v2492_v43  ;;  %v2805_v46 = vpop.f32.mrb[39].mxu1 }
 0x6bc   :  { %v2497_v50 = vadd.f32 %v2891_v48, %v2493_v20  ;;  %v2498_v51 = vsel %vm177_vm1, %v2496_v45, 0.0  ;;  %v2506_v8 = vmul.f32 %v2496_v45, %v2496_v45 }
 0x6bd   :  { %2499 = vadd.xlane.f32.xlu1 %v2498_v51 }
 0x6be   :  { %v2501_v52 = vsel %vm177_vm1, %v2497_v50, 0.0  ;;  %v2507_v53 = vmul.f32 %v2497_v50, %v2497_v50  ;;  %v2508_v59 = vsel %vm177_vm1, %v2506_v8, 0.0 }
 0x6bf   :  { %2502 = vadd.xlane.f32.xlu0 %v2501_v52 }
 0x6c0   :  { %v2511_v29 = vsel %vm177_vm1, %v2507_v53, 0.0 }
 0x6c1   :  { %2512 = vadd.xlane.f32.xlu1 %v2511_v29 }
 0x6c3   :  { %2509 = vadd.xlane.f32.xlu0 %v2508_v59 }
 0x6c4   :  { %3057 = shalt.err (!%p3054_p4)
}
 0x6c5   :  { %s3058_s1 = scalar_lea.hbm %s3839_s15, 1024 }
 0x6c6   :  { %p3059_p5 = scmp.ne.s32.totalorder %s3839_s15, %s3058_s1  ;;  %p3062_p6 = scmp.lt.u32.totalorder %s3058_s1, %s3839_s15 }
 0x6c8   :  { %p3064_p7 = pnand %p3062_p6, %p3059_p5 }
 0x6ca   :  { %3067 = shalt.err (!%p3064_p7)
}
 0x6cb   :  { %2571 = dma.vmem_to_hbm [thread:$0]  %s2566_s16, 1024, %s3839_s15, [#allocation16], %s3845_s20, %s3845_s20, %s3844_s8  }
 0x6cc   :  { %v2632_v25 = vld [vmem:[%s3836_s12] ss:$0 sm:$0xff]  ;;  %s3126_s26 = smov [#allocation14]  }
 0x6cd   :  { %v2633_v16 = vld [vmem:[%s3837_s13] ss:$0 sm:$0xff]  ;;  %s2553_s7 = sshll.u32 %s3126_s26, 4  ;;  %s2554_s7 = int_to_ptr.vmem [resolvable:$true] %s2553_s7 }
 0x6ce   :  { %s3068_s12 = scalar_lea.vmem %s2554_s7, 256  ;;  %p3073_p9 = scmp.lt.s32.totalorder %s2554_s7, %s2554_s7 }
 0x6cf   :  { %p3069_p8 = scmp.ne.s32.totalorder %s2554_s7, %s3068_s12  ;;  %p3074_p10 = scmp.lt.s32.totalorder %s3068_s12, %s3068_s12 }
 0x6d1   :  { %p3075_p11 = por %p3074_p10, %p3073_p9 }
 0x6d3   :  { %p3076_p12 = pnand %p3075_p11, %p3069_p8 }
 0x74a   :  { %v2500_v60 = vpop.xlane.xlu1 %2499 }
 0x74b   :  { %v2504_v47 = vmul.f32 0.03125, %v2500_v60 }
 0x74c   :  { %v2503_v61 = vpop.xlane.xlu0 %2502 }
 0x74d   :  { %v2505_v62 = vmul.f32 0.03125, %v2503_v61  ;;  %v2516_v3 = vmul.f32 %v2504_v47, %v2504_v47  ;;  %v2520_v38 = vsub.f32 %v2496_v45, %v2504_v47 }
 0x74e   :  { %v2513_v54 = vpop.xlane.xlu1 %2512 }
 0x74f   :  { %v2517_v55 = vmul.f32 %v2505_v62, %v2505_v62  ;;  %v2515_v63 = vmul.f32 0.03125, %v2513_v54  ;;  %v2521_v13 = vsub.f32 %v2497_v50, %v2505_v62 }
 0x750   :  { %v2510_v1 = vpop.xlane.xlu0 %2509 }
 0x751   :  { %v2519_v5 = vsub.f32 %v2515_v63, %v2517_v55  ;;  %v2514_v57 = vmul.f32 0.03125, %v2510_v1 }
 0x753   :  { %v2523_v58 = vadd.f32 1e-05, %v2519_v5  ;;  %v2518_v6 = vsub.f32 %v2514_v57, %v2516_v3 }
 0x755   :  { %2886 = vrsqrt.f32 %v2523_v58  ;;  %v2522_v7 = vadd.f32 1e-05, %v2518_v6 }
 0x757   :  { %2888 = vrsqrt.f32 %v2522_v7 }
 0x75f   :  { %v2887_v15 = vpop.eup %2886 }
 0x760   :  { %v2527_v10 = vmul.f32 %v2887_v15, %v2521_v13 }
 0x761   :  { %v2889_v31 = vpop.eup %2888 }
 0x762   :  { %v2526_v17 = vmul.f32 %v2889_v31, %v2520_v38  ;;  %v2536_v18 = vmul.f32 %v2632_v25, %v2527_v10 }
 0x764   :  { %v2535_v19 = vmul.f32 %v2632_v25, %v2526_v17  ;;  %v2545_v49 = vadd.f32 %v2633_v16, %v2536_v18 }
 0x766   :  { %v2544_v21 = vadd.f32 %v2633_v16, %v2535_v19  ;;  %2547 = vst.msk [vmem:[#allocation14 + $0x8] sm:$0xff] %vm177_vm1, %v2545_v49 }
 0x768   :  { %2546 = vst.msk [vmem:[#allocation14] sm:$0xff] %vm177_vm1, %v2544_v21 }
 0x769   :  { %3079 = shalt.err (!%p3076_p12)
}
 0x76a   :  { %s3080_s0 = scalar_lea.hbm %s3838_s14, 256 }
 0x76b   :  { %p3081_p13 = scmp.ne.s32.totalorder %s3838_s14, %s3080_s0  ;;  %p3084_p0 = scmp.lt.u32.totalorder %s3080_s0, %s3838_s14 }
 0x76d   :  { %p3086_p1 = pnand %p3084_p0, %p3081_p13 }
 0x76f   :  { %3089 = shalt.err (!%p3086_p1)
}
 0x770   :  { %2559 = dma.vmem_to_hbm [thread:$0]  %s2554_s7, 256, %s3838_s14, [#allocation4], %s3845_s20, %s3845_s20, %s3844_s8  }
 0x771   :  { %3098 = dma.done.wait [#allocation4], 256  }
 0x772   :  { %3099 = vsyncadd [#allocation4], 4294967040 }
 0x773   :  { %3100 = dma.done.wait [#allocation16], 1024  }
 0x774   :  { %3101 = vsyncadd [#allocation16], 4294966272 }
 0x775   :  { %2578 = vsyncpa [#allocation3], 1 }
 0x776   :  { %2579 = vsyncpa [#allocation6], 1 }
 0x777   :  { %2580 = vsyncpa [#allocation9], 1 }
 0x778   :  { %2581 = vsyncpa [#allocation12], 1 }
 0x779   :  { %2582 = vsyncpa [#allocation4], 1 }
 0x77a   :  { %2583 = vsyncpa [#allocation16], 1 }

</bundles_post_ra>
